<compile_context>
chip_gen: v5e
topology: v5e:2x2
jax: 0.10.0
libtpu: 0.0.40
codegen_flags: <defaults>
</compile_context>

<pallas_src>
import numpy as np

import jax
import jax.numpy as jnp
from jax.experimental import pallas as pl
from jax.experimental.pallas import tpu as pltpu

PATCH = 4                 # patchify stem (stride == kernel -> pure matmul)
EMBED = 32                # true backbone channel dim
MLP_HIDDEN = 4 * EMBED    # 128
HEAD_HIDDEN = 32          # ClassBlock bottleneck
CLASS_NUM = 10

D_PAD = 128               # lane-padded channel dims
MLP_PAD = 128
HEAD_PAD = 128
CLS_PAD = 128

N_MATS = 5                # stem_w, w1, w2, wf, wc   (each 128x128 bf16)
VEC_ROWS = 24             # packed f32 rows per model (see layout below)

# packed vecs row layout (per model)
R_STEM_B, R_DW_B, R_LN_G, R_LN_B, R_B1, R_B2 = 0, 1, 2, 3, 4, 5
R_BF, R_BN_S, R_BN_H, R_BC = 6, 7, 8, 9
R_DW0 = 10                # rows 10..18: depthwise 3x3 tap weights
R_CHMASK = 19             # row 19: 1.0 on the EMBED real lanes (LayerNorm mask)


# ------------------------------ fused kernel ------------------------------- #

def _make_fused_kernel(tokens, wp, d_true):
    """One grid step == full forward of one model-group (all its views/batch)."""

    def kernel(patches_ref, masks_ref, pool_ref, mats_ref, vecs_ref, o_ref):
        v = vecs_ref[...]                                        # (24, 128) f32

        # ---- patch-embed stem: (T, K) @ (K, D) on the MXU (bf16 in, f32 acc) ----
        tok = (jnp.dot(patches_ref[0], mats_ref[0],
                       preferred_element_type=jnp.float32)
               + v[R_STEM_B:R_STEM_B + 1])                       # (T, 128) f32

        # ---- 3x3 depthwise conv: sublane rolls (XLU) + precomputed border masks ----
        acc = jnp.zeros_like(tok)
        for dh in (-1, 0, 1):
            for dc in (-1, 0, 1):
                tap = (dh + 1) * 3 + (dc + 1)
                off = dh * wp + dc
                rolled = tok if off == 0 else pltpu.roll(tok, (-off) % tokens, 0)
                acc = acc + (rolled * masks_ref[tap]) * v[R_DW0 + tap:R_DW0 + tap + 1]
        dwo = acc + v[R_DW_B:R_DW_B + 1]

        # ---- LayerNorm over the true channel count (padded lanes stay inert) ----
        ch_mask = v[R_CHMASK:R_CHMASK + 1]                       # (1, 128)
        inv_d = 1.0 / d_true
        mu = jnp.sum(dwo, axis=-1, keepdims=True) * inv_d
        cent = (dwo - mu) * ch_mask
        var = jnp.sum(cent * cent, axis=-1, keepdims=True) * inv_d
        xn = cent * jax.lax.rsqrt(var + 1e-6) * v[R_LN_G:R_LN_G + 1] + v[R_LN_B:R_LN_B + 1]

        # ---- MLP (D -> 4D -> D) with GELU, residual ----
        # TODO(synk): timm ConvNeXt uses exact erf-GELU; tanh approximation kept here.
        h = (jnp.dot(xn.astype(jnp.bfloat16), mats_ref[1],
                     preferred_element_type=jnp.float32) + v[R_B1:R_B1 + 1])
        h = jax.nn.gelu(h)
        y = (jnp.dot(h.astype(jnp.bfloat16), mats_ref[2],
                     preferred_element_type=jnp.float32) + v[R_B2:R_B2 + 1])
        blk = tok + y                                            # (T, 128) f32

        # ---- head: GAP (pooling matmul) -> Linear -> BN(eval) -> ReLU -> classifier ----
        pooled = jnp.dot(pool_ref[...], blk.astype(jnp.bfloat16),
                         preferred_element_type=jnp.float32)     # (n_img_pad, 128)
        f = (jnp.dot(pooled.astype(jnp.bfloat16), mats_ref[3],
                     preferred_element_type=jnp.float32) + v[R_BF:R_BF + 1])
        f = jnp.maximum(f * v[R_BN_S:R_BN_S + 1] + v[R_BN_H:R_BN_H + 1], 0.0)
        o_ref[0] = (jnp.dot(f.astype(jnp.bfloat16), mats_ref[4],
                            preferred_element_type=jnp.float32) + v[R_BC:R_BC + 1])

    return kernel


# ------------------------- host-side constant tables ------------------------ #

def _tap_masks(n_img, hp, wp):
    """(9, tokens, 128) f32: per-tap validity of the (dh, dc)-shifted source token
    (zero-padding at each image border), pre-broadcast across the 128 lanes."""
    seq = hp * wp
    m = np.zeros((9, n_img * seq, D_PAD), np.float32)
    for dh in (-1, 0, 1):
        for dc in (-1, 0, 1):
            tap = (dh + 1) * 3 + (dc + 1)
            for r in range(hp):
                for c in range(wp):
                    if 0 <= r + dh < hp and 0 <= c + dc < wp:
                        for img in range(n_img):
                            m[tap, img * seq + r * wp + c, :] = 1.0
    return jnp.asarray(m)


def _pool_matrix(n_img, n_img_pad, seq):
    """(n_img_pad, tokens) bf16 pooling matrix: row i has 1/seq over image i's tokens
    (GAP as a single MXU matmul); padded rows are zero."""
    p = np.zeros((n_img_pad, n_img * seq), np.float32)
    for i in range(n_img):
        p[i, i * seq:(i + 1) * seq] = 1.0 / seq
    return jnp.asarray(p, jnp.bfloat16)


# ------------------------------- parameters -------------------------------- #

def _pad2(a, rows, cols):
    return jnp.pad(a, ((0, rows - a.shape[0]), (0, cols - a.shape[1])))


def _row(width, true, value=0.0):
    return jnp.pad(jnp.full((1, true), value, jnp.float32),
                   ((0, 0), (0, width - true)))


def init_convnext_params(key, in_ch):
    # TODO(synk): full timm ConvNeXt depth and the block=4 part-based ClassBlock
    # heads / return_f of make_convnext_model are simplified to one block + one head;
    # BatchNorm is folded to eval-mode scale/shift.
    d = EMBED
    k_true = PATCH * PATCH * in_ch
    assert k_true <= D_PAD, "patchified stem input must fit one 128-lane matrix"
    ks = jax.random.split(key, 6)

    def nrm(k, shape, scale):
        return (scale * jax.random.normal(k, shape)).astype(jnp.float32)

    stem_w = _pad2(nrm(ks[0], (k_true, d), 0.05), D_PAD, D_PAD)
    w1 = _pad2(nrm(ks[1], (d, MLP_HIDDEN), 0.05), D_PAD, MLP_PAD)
    w2 = _pad2(nrm(ks[2], (MLP_HIDDEN, d), 0.05), MLP_PAD, D_PAD)
    wf = _pad2(nrm(ks[3], (d, HEAD_HIDDEN), 0.05), D_PAD, HEAD_PAD)
    wc = _pad2(nrm(ks[4], (HEAD_HIDDEN, CLASS_NUM), 0.05), HEAD_PAD, CLS_PAD)
    mats = jnp.stack([stem_w, w1, w2, wf, wc]).astype(jnp.bfloat16)    # (5,128,128)

    dw_w = _pad2(nrm(ks[5], (9, d), 0.1), 9, D_PAD)                    # (9,128)
    rows = jnp.concatenate([
        _row(D_PAD, d),                     # stem_b
        _row(D_PAD, d),                     # dw_b
        _row(D_PAD, d, 1.0),                # ln_g
        _row(D_PAD, d),                     # ln_b
        _row(MLP_PAD, MLP_HIDDEN),          # b1
        _row(D_PAD, d),                     # b2
        _row(HEAD_PAD, HEAD_HIDDEN),        # bf
        _row(HEAD_PAD, HEAD_HIDDEN, 1.0),   # bn_scale (eval-mode BN)
        _row(HEAD_PAD, HEAD_HIDDEN),        # bn_shift
        _row(CLS_PAD, CLASS_NUM),           # bc
        dw_w,                               # rows 10..18: depthwise taps
        _row(D_PAD, d, 1.0),                # row 19: channel mask for LayerNorm
    ], axis=0)                                                         # (20,128)
    vecs = jnp.pad(rows, ((0, VEC_ROWS - rows.shape[0]), (0, 0)))      # (24,128)
    return {"mats": mats, "vecs": vecs}


def init_three_view_net(key, in_ch, share_weight=False):
    k1, k2 = jax.random.split(key)
    m1 = init_convnext_params(k1, in_ch)
    # share_weight duplicates the (tiny, ~165 KB) packed weights; each copy is
    # still DMA'd only once since each grid step touches exactly one model block.
    m2 = m1 if share_weight else init_convnext_params(k2, in_ch)
    return {"mats": jnp.concatenate([m1["mats"], m2["mats"]], axis=0),   # (10,128,128)
            "vecs": jnp.concatenate([m1["vecs"], m2["vecs"]], axis=0)}   # (48,128)


# ------------------------------ fused forward ------------------------------ #

@jax.jit
def _three_view_fused(params, xs):
    """xs: (2 groups, views_per_group, N, C, H, W); group g runs model g+1."""
    ngrp, v_g, n, c, h, w = xs.shape
    hp, wp = h // PATCH, w // PATCH
    seq = hp * wp
    n_img = v_g * n
    n_img_pad = ((n_img + 7) // 8) * 8
    tokens = n_img * seq
    k_true = PATCH * PATCH * c
    assert tokens % 8 == 0

    # patchify + lane-pad + bf16 (one XLA op chain over all views; the per-group
    # compute then never leaves VMEM)
    x = jnp.transpose(xs, (0, 1, 2, 4, 5, 3)).astype(jnp.float32)       # G,V,N,H,W,C
    x = x.reshape(ngrp, v_g, n, hp, PATCH, wp, PATCH, c)
    x = jnp.transpose(x, (0, 1, 2, 3, 5, 4, 6, 7))                      # G,V,N,hp,wp,P,P,C
    x = x.reshape(ngrp, tokens, k_true)
    patches = jnp.pad(x, ((0, 0), (0, 0), (0, D_PAD - k_true))).astype(jnp.bfloat16)

    masks = _tap_masks(n_img, hp, wp)              # (9, tokens, 128) f32 constant
    pool = _pool_matrix(n_img, n_img_pad, seq)     # (n_img_pad, tokens) bf16 constant
    mats, vecs = params["mats"], params["vecs"]

    kernel = _make_fused_kernel(tokens, wp, EMBED)

    flops_per_group = (2 * tokens * D_PAD * D_PAD            # stem matmul
                       + 27 * tokens * D_PAD                 # depthwise taps
                       + 10 * tokens * D_PAD                 # LN / residual / misc
                       + 4 * tokens * D_PAD * MLP_PAD        # MLP (two matmuls)
                       + 2 * n_img_pad * tokens * D_PAD      # pooling matmul
                       + 2 * n_img_pad * D_PAD * HEAD_PAD    # head linear
                       + 2 * n_img_pad * HEAD_PAD * CLS_PAD) # classifier
    bytes_accessed = int(patches.size * 2 + mats.size * 2 + vecs.size * 4
                         + ngrp * (masks.size * 4 + pool.size * 2)
                         + ngrp * n_img_pad * CLS_PAD * 4)
    cost = pl.CostEstimate(flops=int(ngrp * flops_per_group),
                           transcendentals=int(ngrp * tokens * MLP_PAD),
                           bytes_accessed=bytes_accessed)

    out = pl.pallas_call(
        kernel,
        out_shape=jax.ShapeDtypeStruct((ngrp, n_img_pad, CLS_PAD), jnp.float32),
        grid_spec=pltpu.PrefetchScalarGridSpec(
            num_scalar_prefetch=0,
            grid=(ngrp,),
            in_specs=[
                pl.BlockSpec((1, tokens, D_PAD), lambda g: (g, 0, 0)),      # patches
                pl.BlockSpec((9, tokens, D_PAD), lambda g: (0, 0, 0)),      # tap masks
                pl.BlockSpec((n_img_pad, tokens), lambda g: (0, 0)),        # pool matrix
                pl.BlockSpec((N_MATS, D_PAD, D_PAD), lambda g: (g, 0, 0)),  # model-g matrices
                pl.BlockSpec((VEC_ROWS, D_PAD), lambda g: (g, 0)),          # model-g vectors
            ],
            out_specs=pl.BlockSpec((1, n_img_pad, CLS_PAD), lambda g: (g, 0, 0))),
        compiler_params=pltpu.CompilerParams(
            dimension_semantics=("parallel",),     # one model-group per TensorCore on v7x
            vmem_limit_bytes=32 << 20),
        cost_estimate=cost,
    )(patches, masks, pool, mats, vecs)

    return out[:, :, :CLASS_NUM]                   # drop lane padding


def three_view_net_forward(params, x1, x2, x3, x4=None):
    """Mirrors three_view_net.forward: y1=model_1(x1), y2=model_2(x2),
    y3=model_1(x3), optional y4=model_2(x4); None inputs give None outputs."""
    has_x4 = x4 is not None
    present = [x for x in (x1, x2, x3, x4) if x is not None]
    if not present:
        return (None, None, None, None) if has_x4 else (None, None, None)
    zeros = jnp.zeros_like(present[0])              # missing views run as zeros, discarded
    pick = lambda t: t if t is not None else zeros
    # group 0 -> model_1 views [x1, x3]; group 1 -> model_2 views [x2, x4]
    xs = jnp.stack([jnp.stack([pick(x1), pick(x3)]),
                    jnp.stack([pick(x2), pick(x4)])])            # (2, 2, N, C, H, W)
    logits = _three_view_fused(params, xs)                       # (2, n_img_pad, CLASS_NUM)
    n = present[0].shape[0]
    y1 = logits[0, :n] if x1 is not None else None
    y3 = logits[0, n:2 * n] if x3 is not None else None
    y2 = logits[1, :n] if x2 is not None else None
    y4 = logits[1, n:2 * n] if has_x4 else None
    return (y1, y2, y3, y4) if has_x4 else (y1, y2, y3)


# ---------------------------------- main ----------------------------------- #

if __name__ == "__main__":
    key = jax.random.PRNGKey(0)
    kp, kx1, kx2, kx3 = jax.random.split(key, 4)

    params = init_three_view_net(kp, in_ch=4, share_weight=False)

    x1 = jax.random.normal(kx1, (2, 4, 16, 16), jnp.float32)  # NCHW like PyTorch
    x2 = jax.random.normal(kx2, (2, 4, 16, 16), jnp.float32)
    x3 = jax.random.normal(kx3, (2, 4, 16, 16), jnp.float32)

    y1, y2, y3 = three_view_net_forward(params, x1, x2, x3)
    jax.block_until_ready((y1, y2, y3))

    assert y1.shape == (2, CLASS_NUM)
    assert y2.shape == (2, CLASS_NUM)
    assert y3.shape == (2, CLASS_NUM)
    assert all(bool(jnp.all(jnp.isfinite(y))) for y in (y1, y2, y3))
    print("KERNEL_OK")
</pallas_src>

<mosaic_0001>
module attributes {stable_mosaic.version = 11 : i64} {
  func.func @kernel(%arg0: i32, %arg1: memref<1x64x128xbf16, #tpu.memory_space<vmem>>, %arg2: memref<9x64x128xf32, #tpu.memory_space<vmem>>, %arg3: memref<8x64xbf16, #tpu.memory_space<vmem>>, %arg4: memref<5x128x128xbf16, #tpu.memory_space<vmem>>, %arg5: memref<24x128xf32, #tpu.memory_space<vmem>>, %arg6: memref<1x8x128xf32, #tpu.memory_space<vmem>>) attributes {dimension_semantics = [#tpu.dimension_semantics<parallel>], iteration_bounds = array<i64: 2>, scalar_prefetch = 0 : i64, scratch_operands = 0 : i64, tpu.core_type = #tpu.core_type<tc>, window_params = [{transform_indices = @transform_0, window_bounds = array<i64: 1, 64, 128>}, {pipeline_mode = #tpu.pipeline_mode<synchronous>, transform_indices = @transform_1, window_bounds = array<i64: 9, 64, 128>}, {pipeline_mode = #tpu.pipeline_mode<synchronous>, transform_indices = @transform_2, window_bounds = array<i64: 8, 64>}, {transform_indices = @transform_3, window_bounds = array<i64: 5, 128, 128>}, {transform_indices = @transform_4, window_bounds = array<i64: 24, 128>}, {transform_indices = @transform_5, window_bounds = array<i64: 1, 8, 128>}]} {
    %c0 = arith.constant 0 : index
    %c0_0 = arith.constant 0 : index
    %0 = vector.load %arg5[%c0, %c0_0] : memref<24x128xf32, #tpu.memory_space<vmem>>, vector<24x128xf32>
    %c0_1 = arith.constant 0 : index
    %c0_2 = arith.constant 0 : index
    %c0_3 = arith.constant 0 : index
    %1 = vector.load %arg1[%c0_1, %c0_2, %c0_3] : memref<1x64x128xbf16, #tpu.memory_space<vmem>>, vector<1x64x128xbf16>
    %2 = vector.shape_cast %1 : vector<1x64x128xbf16> to vector<64x128xbf16>
    %c0_4 = arith.constant 0 : index
    %c0_5 = arith.constant 0 : index
    %c0_6 = arith.constant 0 : index
    %3 = vector.load %arg4[%c0_4, %c0_5, %c0_6] : memref<5x128x128xbf16, #tpu.memory_space<vmem>>, vector<1x128x128xbf16>
    %4 = vector.shape_cast %3 : vector<1x128x128xbf16> to vector<128x128xbf16>
    %cst = arith.constant dense<0.000000e+00> : vector<64x128xf32>
    %5 = tpu.matmul %2, %4, %cst {dimension_numbers = #tpu.dot_dimension_numbers<[1], [0], [0], [1], [0, 0, 1, 1], [], []>} : vector<64x128xbf16>, vector<128x128xbf16>, vector<64x128xf32> -> vector<64x128xf32>
    %6 = vector.extract_strided_slice %0 {offsets = [0, 0], sizes = [1, 128], strides = [1, 1]} : vector<24x128xf32> to vector<1x128xf32>
    %7 = vector.broadcast %6 : vector<1x128xf32> to vector<64x128xf32>
    %8 = arith.addf %5, %7 : vector<64x128xf32>
    %cst_7 = arith.constant 0.000000e+00 : f32
    %9 = vector.broadcast %cst_7 : f32 to vector<64x128xf32>
    %c5_i32 = arith.constant 5 : i32
    %10 = tpu.dynamic_rotate %8 by %c5_i32 dim 0 : vector<64x128xf32>, i32 -> vector<64x128xf32>
    %c0_8 = arith.constant 0 : index
    %c0_9 = arith.constant 0 : index
    %c0_10 = arith.constant 0 : index
    %11 = vector.load %arg2[%c0_8, %c0_9, %c0_10] : memref<9x64x128xf32, #tpu.memory_space<vmem>>, vector<1x64x128xf32>
    %12 = vector.shape_cast %11 : vector<1x64x128xf32> to vector<64x128xf32>
    %13 = arith.mulf %10, %12 : vector<64x128xf32>
    %14 = vector.extract_strided_slice %0 {offsets = [10, 0], sizes = [1, 128], strides = [1, 1]} : vector<24x128xf32> to vector<1x128xf32>
    %15 = vector.broadcast %14 : vector<1x128xf32> to vector<64x128xf32>
    %16 = arith.mulf %13, %15 : vector<64x128xf32>
    %17 = arith.addf %9, %16 : vector<64x128xf32>
    %c4_i32 = arith.constant 4 : i32
    %18 = tpu.dynamic_rotate %8 by %c4_i32 dim 0 : vector<64x128xf32>, i32 -> vector<64x128xf32>
    %c1 = arith.constant 1 : index
    %c0_11 = arith.constant 0 : index
    %c0_12 = arith.constant 0 : index
    %19 = vector.load %arg2[%c1, %c0_11, %c0_12] : memref<9x64x128xf32, #tpu.memory_space<vmem>>, vector<1x64x128xf32>
    %20 = vector.shape_cast %19 : vector<1x64x128xf32> to vector<64x128xf32>
    %21 = arith.mulf %18, %20 : vector<64x128xf32>
    %22 = vector.extract_strided_slice %0 {offsets = [11, 0], sizes = [1, 128], strides = [1, 1]} : vector<24x128xf32> to vector<1x128xf32>
    %23 = vector.broadcast %22 : vector<1x128xf32> to vector<64x128xf32>
    %24 = arith.mulf %21, %23 : vector<64x128xf32>
    %25 = arith.addf %17, %24 : vector<64x128xf32>
    %c3_i32 = arith.constant 3 : i32
    %26 = tpu.dynamic_rotate %8 by %c3_i32 dim 0 : vector<64x128xf32>, i32 -> vector<64x128xf32>
    %c2 = arith.constant 2 : index
    %c0_13 = arith.constant 0 : index
    %c0_14 = arith.constant 0 : index
    %27 = vector.load %arg2[%c2, %c0_13, %c0_14] : memref<9x64x128xf32, #tpu.memory_space<vmem>>, vector<1x64x128xf32>
    %28 = vector.shape_cast %27 : vector<1x64x128xf32> to vector<64x128xf32>
    %29 = arith.mulf %26, %28 : vector<64x128xf32>
    %30 = vector.extract_strided_slice %0 {offsets = [12, 0], sizes = [1, 128], strides = [1, 1]} : vector<24x128xf32> to vector<1x128xf32>
    %31 = vector.broadcast %30 : vector<1x128xf32> to vector<64x128xf32>
    %32 = arith.mulf %29, %31 : vector<64x128xf32>
    %33 = arith.addf %25, %32 : vector<64x128xf32>
    %c1_i32 = arith.constant 1 : i32
    %34 = tpu.dynamic_rotate %8 by %c1_i32 dim 0 : vector<64x128xf32>, i32 -> vector<64x128xf32>
    %c3 = arith.constant 3 : index
    %c0_15 = arith.constant 0 : index
    %c0_16 = arith.constant 0 : index
    %35 = vector.load %arg2[%c3, %c0_15, %c0_16] : memref<9x64x128xf32, #tpu.memory_space<vmem>>, vector<1x64x128xf32>
    %36 = vector.shape_cast %35 : vector<1x64x128xf32> to vector<64x128xf32>
    %37 = arith.mulf %34, %36 : vector<64x128xf32>
    %38 = vector.extract_strided_slice %0 {offsets = [13, 0], sizes = [1, 128], strides = [1, 1]} : vector<24x128xf32> to vector<1x128xf32>
    %39 = vector.broadcast %38 : vector<1x128xf32> to vector<64x128xf32>
    %40 = arith.mulf %37, %39 : vector<64x128xf32>
    %41 = arith.addf %33, %40 : vector<64x128xf32>
    %c4 = arith.constant 4 : index
    %c0_17 = arith.constant 0 : index
    %c0_18 = arith.constant 0 : index
    %42 = vector.load %arg2[%c4, %c0_17, %c0_18] : memref<9x64x128xf32, #tpu.memory_space<vmem>>, vector<1x64x128xf32>
    %43 = vector.shape_cast %42 : vector<1x64x128xf32> to vector<64x128xf32>
    %44 = arith.mulf %8, %43 : vector<64x128xf32>
    %45 = vector.extract_strided_slice %0 {offsets = [14, 0], sizes = [1, 128], strides = [1, 1]} : vector<24x128xf32> to vector<1x128xf32>
    %46 = vector.broadcast %45 : vector<1x128xf32> to vector<64x128xf32>
    %47 = arith.mulf %44, %46 : vector<64x128xf32>
    %48 = arith.addf %41, %47 : vector<64x128xf32>
    %c63_i32 = arith.constant 63 : i32
    %49 = tpu.dynamic_rotate %8 by %c63_i32 dim 0 : vector<64x128xf32>, i32 -> vector<64x128xf32>
    %c5 = arith.constant 5 : index
    %c0_19 = arith.constant 0 : index
    %c0_20 = arith.constant 0 : index
    %50 = vector.load %arg2[%c5, %c0_19, %c0_20] : memref<9x64x128xf32, #tpu.memory_space<vmem>>, vector<1x64x128xf32>
    %51 = vector.shape_cast %50 : vector<1x64x128xf32> to vector<64x128xf32>
    %52 = arith.mulf %49, %51 : vector<64x128xf32>
    %53 = vector.extract_strided_slice %0 {offsets = [15, 0], sizes = [1, 128], strides = [1, 1]} : vector<24x128xf32> to vector<1x128xf32>
    %54 = vector.broadcast %53 : vector<1x128xf32> to vector<64x128xf32>
    %55 = arith.mulf %52, %54 : vector<64x128xf32>
    %56 = arith.addf %48, %55 : vector<64x128xf32>
    %c61_i32 = arith.constant 61 : i32
    %57 = tpu.dynamic_rotate %8 by %c61_i32 dim 0 : vector<64x128xf32>, i32 -> vector<64x128xf32>
    %c6 = arith.constant 6 : index
    %c0_21 = arith.constant 0 : index
    %c0_22 = arith.constant 0 : index
    %58 = vector.load %arg2[%c6, %c0_21, %c0_22] : memref<9x64x128xf32, #tpu.memory_space<vmem>>, vector<1x64x128xf32>
    %59 = vector.shape_cast %58 : vector<1x64x128xf32> to vector<64x128xf32>
    %60 = arith.mulf %57, %59 : vector<64x128xf32>
    %61 = vector.extract_strided_slice %0 {offsets = [16, 0], sizes = [1, 128], strides = [1, 1]} : vector<24x128xf32> to vector<1x128xf32>
    %62 = vector.broadcast %61 : vector<1x128xf32> to vector<64x128xf32>
    %63 = arith.mulf %60, %62 : vector<64x128xf32>
    %64 = arith.addf %56, %63 : vector<64x128xf32>
    %c60_i32 = arith.constant 60 : i32
    %65 = tpu.dynamic_rotate %8 by %c60_i32 dim 0 : vector<64x128xf32>, i32 -> vector<64x128xf32>
    %c7 = arith.constant 7 : index
    %c0_23 = arith.constant 0 : index
    %c0_24 = arith.constant 0 : index
    %66 = vector.load %arg2[%c7, %c0_23, %c0_24] : memref<9x64x128xf32, #tpu.memory_space<vmem>>, vector<1x64x128xf32>
    %67 = vector.shape_cast %66 : vector<1x64x128xf32> to vector<64x128xf32>
    %68 = arith.mulf %65, %67 : vector<64x128xf32>
    %69 = vector.extract_strided_slice %0 {offsets = [17, 0], sizes = [1, 128], strides = [1, 1]} : vector<24x128xf32> to vector<1x128xf32>
    %70 = vector.broadcast %69 : vector<1x128xf32> to vector<64x128xf32>
    %71 = arith.mulf %68, %70 : vector<64x128xf32>
    %72 = arith.addf %64, %71 : vector<64x128xf32>
    %c59_i32 = arith.constant 59 : i32
    %73 = tpu.dynamic_rotate %8 by %c59_i32 dim 0 : vector<64x128xf32>, i32 -> vector<64x128xf32>
    %c8 = arith.constant 8 : index
    %c0_25 = arith.constant 0 : index
    %c0_26 = arith.constant 0 : index
    %74 = vector.load %arg2[%c8, %c0_25, %c0_26] : memref<9x64x128xf32, #tpu.memory_space<vmem>>, vector<1x64x128xf32>
    %75 = vector.shape_cast %74 : vector<1x64x128xf32> to vector<64x128xf32>
    %76 = arith.mulf %73, %75 : vector<64x128xf32>
    %77 = vector.extract_strided_slice %0 {offsets = [18, 0], sizes = [1, 128], strides = [1, 1]} : vector<24x128xf32> to vector<1x128xf32>
    %78 = vector.broadcast %77 : vector<1x128xf32> to vector<64x128xf32>
    %79 = arith.mulf %76, %78 : vector<64x128xf32>
    %80 = arith.addf %72, %79 : vector<64x128xf32>
    %81 = vector.extract_strided_slice %0 {offsets = [1, 0], sizes = [1, 128], strides = [1, 1]} : vector<24x128xf32> to vector<1x128xf32>
    %82 = vector.broadcast %81 : vector<1x128xf32> to vector<64x128xf32>
    %83 = arith.addf %80, %82 : vector<64x128xf32>
    %84 = vector.extract_strided_slice %0 {offsets = [19, 0], sizes = [1, 128], strides = [1, 1]} : vector<24x128xf32> to vector<1x128xf32>
    %cst_27 = arith.constant dense<0.000000e+00> : vector<64xf32>
    %85 = vector.multi_reduction <add>, %83, %cst_27 [1] : vector<64x128xf32> to vector<64xf32>
    %86 = vector.shape_cast %85 : vector<64xf32> to vector<64x1xf32>
    %cst_28 = arith.constant 3.125000e-02 : f32
    %87 = vector.broadcast %cst_28 : f32 to vector<64x1xf32>
    %88 = arith.mulf %86, %87 : vector<64x1xf32>
    %89 = vector.broadcast %88 : vector<64x1xf32> to vector<64x128xf32>
    %90 = arith.subf %83, %89 : vector<64x128xf32>
    %91 = vector.broadcast %84 : vector<1x128xf32> to vector<64x128xf32>
    %92 = arith.mulf %90, %91 : vector<64x128xf32>
    %93 = arith.mulf %92, %92 : vector<64x128xf32>
    %cst_29 = arith.constant dense<0.000000e+00> : vector<64xf32>
    %94 = vector.multi_reduction <add>, %93, %cst_29 [1] : vector<64x128xf32> to vector<64xf32>
    %95 = vector.shape_cast %94 : vector<64xf32> to vector<64x1xf32>
    %cst_30 = arith.constant 3.125000e-02 : f32
    %96 = vector.broadcast %cst_30 : f32 to vector<64x1xf32>
    %97 = arith.mulf %95, %96 : vector<64x1xf32>
    %cst_31 = arith.constant 9.99999997E-7 : f32
    %98 = vector.broadcast %cst_31 : f32 to vector<64x1xf32>
    %99 = arith.addf %97, %98 : vector<64x1xf32>
    %100 = math.rsqrt %99 : vector<64x1xf32>
    %101 = vector.broadcast %100 : vector<64x1xf32> to vector<64x128xf32>
    %102 = arith.mulf %92, %101 : vector<64x128xf32>
    %103 = vector.extract_strided_slice %0 {offsets = [2, 0], sizes = [1, 128], strides = [1, 1]} : vector<24x128xf32> to vector<1x128xf32>
    %104 = vector.broadcast %103 : vector<1x128xf32> to vector<64x128xf32>
    %105 = arith.mulf %102, %104 : vector<64x128xf32>
    %106 = vector.extract_strided_slice %0 {offsets = [3, 0], sizes = [1, 128], strides = [1, 1]} : vector<24x128xf32> to vector<1x128xf32>
    %107 = vector.broadcast %106 : vector<1x128xf32> to vector<64x128xf32>
    %108 = arith.addf %105, %107 : vector<64x128xf32>
    %109 = arith.truncf %108 : vector<64x128xf32> to vector<64x128xbf16>
    %c1_32 = arith.constant 1 : index
    %c0_33 = arith.constant 0 : index
    %c0_34 = arith.constant 0 : index
    %110 = vector.load %arg4[%c1_32, %c0_33, %c0_34] : memref<5x128x128xbf16, #tpu.memory_space<vmem>>, vector<1x128x128xbf16>
    %111 = vector.shape_cast %110 : vector<1x128x128xbf16> to vector<128x128xbf16>
    %cst_35 = arith.constant dense<0.000000e+00> : vector<64x128xf32>
    %112 = tpu.matmul %109, %111, %cst_35 {dimension_numbers = #tpu.dot_dimension_numbers<[1], [0], [0], [1], [0, 0, 1, 1], [], []>} : vector<64x128xbf16>, vector<128x128xbf16>, vector<64x128xf32> -> vector<64x128xf32>
    %113 = vector.extract_strided_slice %0 {offsets = [4, 0], sizes = [1, 128], strides = [1, 1]} : vector<24x128xf32> to vector<1x128xf32>
    %114 = vector.broadcast %113 : vector<1x128xf32> to vector<64x128xf32>
    %115 = arith.addf %112, %114 : vector<64x128xf32>
    %116 = arith.mulf %115, %115 : vector<64x128xf32>
    %117 = arith.mulf %115, %116 : vector<64x128xf32>
    %cst_36 = arith.constant 4.471500e-02 : f32
    %118 = vector.broadcast %cst_36 : f32 to vector<64x128xf32>
    %119 = arith.mulf %118, %117 : vector<64x128xf32>
    %120 = arith.addf %115, %119 : vector<64x128xf32>
    %cst_37 = arith.constant 0.797884583 : f32
    %121 = vector.broadcast %cst_37 : f32 to vector<64x128xf32>
    %122 = arith.mulf %121, %120 : vector<64x128xf32>
    %123 = math.tanh %122 : vector<64x128xf32>
    %cst_38 = arith.constant 1.000000e+00 : f32
    %124 = vector.broadcast %cst_38 : f32 to vector<64x128xf32>
    %125 = arith.addf %124, %123 : vector<64x128xf32>
    %cst_39 = arith.constant 5.000000e-01 : f32
    %126 = vector.broadcast %cst_39 : f32 to vector<64x128xf32>
    %127 = arith.mulf %126, %125 : vector<64x128xf32>
    %128 = arith.mulf %115, %127 : vector<64x128xf32>
    %129 = arith.truncf %128 : vector<64x128xf32> to vector<64x128xbf16>
    %c2_40 = arith.constant 2 : index
    %c0_41 = arith.constant 0 : index
    %c0_42 = arith.constant 0 : index
    %130 = vector.load %arg4[%c2_40, %c0_41, %c0_42] : memref<5x128x128xbf16, #tpu.memory_space<vmem>>, vector<1x128x128xbf16>
    %131 = vector.shape_cast %130 : vector<1x128x128xbf16> to vector<128x128xbf16>
    %cst_43 = arith.constant dense<0.000000e+00> : vector<64x128xf32>
    %132 = tpu.matmul %129, %131, %cst_43 {dimension_numbers = #tpu.dot_dimension_numbers<[1], [0], [0], [1], [0, 0, 1, 1], [], []>} : vector<64x128xbf16>, vector<128x128xbf16>, vector<64x128xf32> -> vector<64x128xf32>
    %133 = vector.extract_strided_slice %0 {offsets = [5, 0], sizes = [1, 128], strides = [1, 1]} : vector<24x128xf32> to vector<1x128xf32>
    %134 = vector.broadcast %133 : vector<1x128xf32> to vector<64x128xf32>
    %135 = arith.addf %132, %134 : vector<64x128xf32>
    %136 = arith.addf %8, %135 : vector<64x128xf32>
    %c0_44 = arith.constant 0 : index
    %c0_45 = arith.constant 0 : index
    %137 = vector.load %arg3[%c0_44, %c0_45] : memref<8x64xbf16, #tpu.memory_space<vmem>>, vector<8x64xbf16>
    %138 = arith.truncf %136 : vector<64x128xf32> to vector<64x128xbf16>
    %cst_46 = arith.constant dense<0.000000e+00> : vector<8x128xf32>
    %139 = tpu.matmul %137, %138, %cst_46 {dimension_numbers = #tpu.dot_dimension_numbers<[1], [0], [0], [1], [0, 0, 1, 1], [], []>} : vector<8x64xbf16>, vector<64x128xbf16>, vector<8x128xf32> -> vector<8x128xf32>
    %140 = arith.truncf %139 : vector<8x128xf32> to vector<8x128xbf16>
    %c3_47 = arith.constant 3 : index
    %c0_48 = arith.constant 0 : index
    %c0_49 = arith.constant 0 : index
    %141 = vector.load %arg4[%c3_47, %c0_48, %c0_49] : memref<5x128x128xbf16, #tpu.memory_space<vmem>>, vector<1x128x128xbf16>
    %142 = vector.shape_cast %141 : vector<1x128x128xbf16> to vector<128x128xbf16>
    %cst_50 = arith.constant dense<0.000000e+00> : vector<8x128xf32>
    %143 = tpu.matmul %140, %142, %cst_50 {dimension_numbers = #tpu.dot_dimension_numbers<[1], [0], [0], [1], [0, 0, 1, 1], [], []>} : vector<8x128xbf16>, vector<128x128xbf16>, vector<8x128xf32> -> vector<8x128xf32>
    %144 = vector.extract_strided_slice %0 {offsets = [6, 0], sizes = [1, 128], strides = [1, 1]} : vector<24x128xf32> to vector<1x128xf32>
    %145 = vector.broadcast %144 : vector<1x128xf32> to vector<8x128xf32>
    %146 = arith.addf %143, %145 : vector<8x128xf32>
    %147 = vector.extract_strided_slice %0 {offsets = [7, 0], sizes = [1, 128], strides = [1, 1]} : vector<24x128xf32> to vector<1x128xf32>
    %148 = vector.broadcast %147 : vector<1x128xf32> to vector<8x128xf32>
    %149 = arith.mulf %146, %148 : vector<8x128xf32>
    %150 = vector.extract_strided_slice %0 {offsets = [8, 0], sizes = [1, 128], strides = [1, 1]} : vector<24x128xf32> to vector<1x128xf32>
    %151 = vector.broadcast %150 : vector<1x128xf32> to vector<8x128xf32>
    %152 = arith.addf %149, %151 : vector<8x128xf32>
    %cst_51 = arith.constant 0.000000e+00 : f32
    %153 = vector.broadcast %cst_51 : f32 to vector<8x128xf32>
    %154 = arith.maximumf %152, %153 : vector<8x128xf32>
    %155 = arith.truncf %154 : vector<8x128xf32> to vector<8x128xbf16>
    %c4_52 = arith.constant 4 : index
    %c0_53 = arith.constant 0 : index
    %c0_54 = arith.constant 0 : index
    %156 = vector.load %arg4[%c4_52, %c0_53, %c0_54] : memref<5x128x128xbf16, #tpu.memory_space<vmem>>, vector<1x128x128xbf16>
    %157 = vector.shape_cast %156 : vector<1x128x128xbf16> to vector<128x128xbf16>
    %cst_55 = arith.constant dense<0.000000e+00> : vector<8x128xf32>
    %158 = tpu.matmul %155, %157, %cst_55 {dimension_numbers = #tpu.dot_dimension_numbers<[1], [0], [0], [1], [0, 0, 1, 1], [], []>} : vector<8x128xbf16>, vector<128x128xbf16>, vector<8x128xf32> -> vector<8x128xf32>
    %159 = vector.extract_strided_slice %0 {offsets = [9, 0], sizes = [1, 128], strides = [1, 1]} : vector<24x128xf32> to vector<1x128xf32>
    %160 = vector.broadcast %159 : vector<1x128xf32> to vector<8x128xf32>
    %161 = arith.addf %158, %160 : vector<8x128xf32>
    %c0_56 = arith.constant 0 : index
    %c0_57 = arith.constant 0 : index
    %c0_58 = arith.constant 0 : index
    %162 = vector.load %arg6[%c0_56, %c0_57, %c0_58] : memref<1x8x128xf32, #tpu.memory_space<vmem>>, vector<1x8x128xf32>
    %163 = vector.shape_cast %162 : vector<1x8x128xf32> to vector<8x128xf32>
    %164 = vector.shape_cast %161 : vector<8x128xf32> to vector<1x8x128xf32>
    tpu.vector_store %arg6[%c0_56, %c0_57, %c0_58], %164 {strides = array<i32>} : memref<1x8x128xf32, #tpu.memory_space<vmem>>, vector<1x8x128xf32>,
    return
  }
  func.func @transform_0(%arg0: i32) -> (i32, i32, i32) {
    %c0_i32 = arith.constant 0 : i32
    %c0_i32_0 = arith.constant 0 : i32
    %c0_i32_1 = arith.constant 0 : i32
    return %arg0, %c0_i32, %c0_i32_0 : i32, i32, i32
  }
  func.func @transform_1(%arg0: i32) -> (i32, i32, i32) {
    %c0_i32 = arith.constant 0 : i32
    %c0_i32_0 = arith.constant 0 : i32
    %c0_i32_1 = arith.constant 0 : i32
    %c0_i32_2 = arith.constant 0 : i32
    return %c0_i32, %c0_i32_0, %c0_i32_1 : i32, i32, i32
  }
  func.func @transform_2(%arg0: i32) -> (i32, i32) {
    %c0_i32 = arith.constant 0 : i32
    %c0_i32_0 = arith.constant 0 : i32
    %c0_i32_1 = arith.constant 0 : i32
    return %c0_i32, %c0_i32_0 : i32, i32
  }
  func.func @transform_3(%arg0: i32) -> (i32, i32, i32) {
    %c0_i32 = arith.constant 0 : i32
    %c0_i32_0 = arith.constant 0 : i32
    %c0_i32_1 = arith.constant 0 : i32
    return %arg0, %c0_i32, %c0_i32_0 : i32, i32, i32
  }
  func.func @transform_4(%arg0: i32) -> (i32, i32) {
    %c0_i32 = arith.constant 0 : i32
    %c0_i32_0 = arith.constant 0 : i32
    return %arg0, %c0_i32 : i32, i32
  }
  func.func @transform_5(%arg0: i32) -> (i32, i32, i32) {
    %c0_i32 = arith.constant 0 : i32
    %c0_i32_0 = arith.constant 0 : i32
    %c0_i32_1 = arith.constant 0 : i32
    return %arg0, %c0_i32, %c0_i32_0 : i32, i32, i32
  }
}

</mosaic_0001>

<bundles_post_ra>
// kernel: _three_view_fused.1
= control target key start
LH: loop header
LB: loop body
LE: loop exit
PB: predicated region body
PF: predicated region fallthrough
CT: control target
= control target key end

     0   :  { %10 = vsyncpa [#allocation3], 0  ;;  %s2972_s0 = inlined_call_operand.vmem [shape: bf16[2,64,128], index: 0, kind: input, shape index: {}]   ;;  %s2973_s1 = inlined_call_operand.vmem [shape: f32[9,64,128], index: 1, kind: input, shape index: {}]   ;;  %s2974_s2 = inlined_call_operand.vmem [shape: bf16[8,64], index: 2, kind: input, shape index: {}]   ;;  %s2975_s3 = inlined_call_operand.vmem [shape: bf16[10,128,128], index: 3, kind: input, shape index: {}]   ;;  %s2976_s4 = inlined_call_operand.vmem [shape: f32[48,128], index: 4, kind: input, shape index: {}]   ;;  %s2977_s5 = inlined_call_operand.hbm [shape: f32[2,8,128], index: 5, kind: output, shape index: {}]  }
   0x1   :  { %12 = vsyncpa [#allocation3 + $0x1], 0  ;;  %s2085_s18 = smov 0   ;;  %s2087_s19 = smov 0  }
   0x2   :  { %s2089_s20 = smov 0   ;;  %s2091_s21 = smov 0  }
   0x3 LB: > { %s2106_s22 = sadd.s32 4294967295, %s2053_s21   ;;  %s1553_s23 = sadd.s32 4294967294, %s2053_s21   ;;  %s2053_s21 = sphi %s2091_s21, %s3003_s21   ;;  %s2049_s20 = sphi %s2089_s20, %s3002_s20   ;;  %s2045_s19 = sphi %s2087_s19, %s3001_s19   ;;  %s2041_s18 = sphi %s2085_s18, %s3000_s18  }
   0x4   : > { %s2110_s24 = sadd.s32 1, %s2053_s21   ;;  %s145_s25 = sadd.s32 1, %s2049_s20 }
   0x5   : > { %s142_s26 = ssub.s32 %s2053_s21, %s2110_s24  ;;  %p155_p0 = scmp.ne.s32.totalorder %s2049_s20, %s2045_s19 }
   0x6   : > { %p143_p1 = scmp.eq.s32.totalorder %s142_s26, 0  ;;  %p156_p2 = scmp.eq.s32.totalorder %s2106_s22, 1 }
   0x7   : > { %p161_p3 = scmp.ne.s32.totalorder %s2045_s19, %s2041_s18  ;;  %p162_p4 = scmp.eq.s32.totalorder %s1553_s23, 1 }
   0x8   : > { %s2121_s27 = scalar_select %p143_p1, %s2049_s20, %s145_s25  }
   0x9   : > { %p2123_p5 = por %p156_p2, %p155_p0  ;;  %p2127_p6 = por %p162_p4, %p161_p3 }
   0xa   : > { %p1556_p7 = scmp.ge.s32.totalorder %s2053_s21, 1  ;;  %p213_p8 = scmp.lt.s32.totalorder %s2053_s21, 3 }
   0xc   : > { %p214_p9 = pnand %p1556_p7, %p213_p8 }
   0xe   : > { %217 = sbr.rel (%p214_p9) target bundleno = 1342 (0x53e), region = 40 }
  0x13   : > { %s257_s30 = smul.u32 5, %s2106_s22  ;;  %p252_p11 = scmp.lt.s32.totalorder %s2106_s22, 1  ;;  %v408_v14 = vlaneseq  ;;  %v1612_v28 = vld [vmem:[%s2973_s1 + $0x48] sm:$0xff]  ;;  %v1635_v43 = vld [vmem:[%s2973_s1 + $0x100] sm:$0xff]  ;;  %v1637_v56 = vld [vmem:[%s2973_s1 + $0x110] sm:$0xff] }
  0x14   : > { %s264_s15 = smul.u32 3, %s2106_s22  ;;  %v1620_v29 = vld [vmem:[%s2973_s1 + $0x88] sm:$0xff]  ;;  %v1643_v47 = vld [vmem:[%s2973_s1 + $0x140] sm:$0xff]  ;;  %v421_v61 = vld [vmem:[%s2973_s1 + $0x10] sm:$0xff]  ;;  %s1869_s12 = sshll.u32 %s2106_s22, 3 }
  0x15   : > { %p258_p10 = scmp.lt.s32.totalorder %s257_s30, 9  ;;  %v2164_v16 = vshrl.u32 %v408_v14, 7  ;;  %v420_v32 = vld [vmem:[%s2973_s1 + $0x8] sm:$0xff]  ;;  %v1613_v62 = vld [vmem:[%s2973_s1 + $0x50] sm:$0xff]  ;;  %s2011_s7 = scalar_lea.hbm %s2977_s5, 16 }
  0x16   : > { %s253_s10 = scalar_select %p252_p11, %s2106_s22, 1  ;;  %v1636_v49 = vld [vmem:[%s2973_s1 + $0x108] sm:$0xff] }
  0x17   : > { %s3005_s30 = smov (!%p258_p10, %s257_s30), 9  ;;  %p265_p12 = scmp.lt.s32.totalorder %s264_s15, 5  ;;  %vm410_vm0 = vcmp.lt.s32.totalorder %v2164_v16, 5  ;;  %vm460_vm1 = vcmp.lt.s32.totalorder %v2164_v16, 4  ;;  %vm511_vm2 = vcmp.lt.s32.totalorder %v2164_v16, 3  ;;  %vm562_vm3 = vcmp.lt.s32.totalorder %v2164_v16, 1 }
  0x18   : > { %s1873_s6 = sshll.u32 %s3005_s30, 6  ;;  %s1872_s11 = sshll.u32 %s253_s10, 5  ;;  %vm647_vm4 = vcmp.lt.s32.totalorder %v2164_v16, 7  ;;  %v1628_v60 = vld [vmem:[%s2973_s1 + $0xc8] sm:$0xff]  ;;  %v1665_v16 = vld [vmem:[%s2973_s1 + $0x1f0] sm:$0xff] }
  0x19   : > { %s2137_s9 = scalar_lea.vmem %s2975_s3, %s1873_s6  ;;  %s256_s14 = scalar_lea.vmem %s2972_s0, %s1872_s11 }
  0x1a   : > { %v1885_v0 = vld [vmem:[%s2137_s9 + $0x38] sm:$0xff]  ;;  %v1884_v1 = vld [vmem:[%s2137_s9 + $0x30] sm:$0xff]  ;;  %v1883_v2 = vld [vmem:[%s2137_s9 + $0x28] sm:$0xff]  ;;  %s3007_s15 = smov (!%p265_p12, %s264_s15), 5  ;;  %s249_s11 = sand.u32 1, %s2045_s19  }
  0x1b   : > { %371 = vmatpush.bf16.msra.mxu0 %v1885_v0  ;;  %v1882_v3 = vld [vmem:[%s2137_s9 + $0x20] sm:$0xff]  ;;  %v1881_v4 = vld [vmem:[%s2137_s9 + $0x18] sm:$0xff]  ;;  %v1880_v5 = vld [vmem:[%s2137_s9 + $0x10] sm:$0xff]  ;;  %s1562_s16 = sshll.u32 %s3007_s15, 3  ;;  %s1557_s13 = sshll.u32 %s249_s11, 3 }
  0x1c   : > { %v1879_v6 = vld [vmem:[%s2137_s9 + $0x8] sm:$0xff]  ;;  %v1878_v7 = vld [vmem:[%s2137_s9] sm:$0xff]  ;;  %v1876_v10 = vld [vmem:[%s256_s14 + $0x10] sm:$0xff]  ;;  %s2156_s25 = scalar_lea.vmem %s2976_s4, %s1562_s16  ;;  %s1465_s15 = scalar_lea.hbm %s2977_s5, %s1869_s12 }
  0x1d   : > { %v1874_v8 = vld [vmem:[%s256_s14] sm:$0xff]  ;;  %v1875_v9 = vld [vmem:[%s256_s14 + $0x8] sm:$0xff]  ;;  %v1877_v11 = vld [vmem:[%s256_s14 + $0x18] sm:$0xff]  ;;  %s251_s16 = scalar_lea.vmem [#allocation2], %s1557_s13  ;;  %s1469_s23 = sshll.u32 %s1465_s15, 4  ;;  %s1470_s23 = int_to_ptr.hbm [resolvable:$true] %s1469_s23 }
  0x1e   : > { %v2159_v12 = vld [vmem:[%s2156_s25] sm:$0xff]  ;;  %v272_v17 = vld [vmem:[%s2156_s25 + $0x8] sm:$0xff]  ;;  %v2200_v34 = vld [vmem:[%s2156_s25 + $0x10] sm:$0xff]  ;;  %s1467_s17 = sshll.u32 %s251_s16, 4  ;;  %s2005_s26 = sshra.s32 %s1470_s23, 4  ;;  %s1468_s17 = int_to_ptr.vmem [resolvable:$true] %s1467_s17  ;;  %s2006_s26 = int_to_ptr.hbm [resolvable:$true] %s2005_s26 }
  0x1f   : > { %372 = vmatpush.bf16.msra.mxu0 %v1884_v1  ;;  %v2162_v15 = vperm.slane %v2159_v12, 0  ;;  %v2175_v21 = vperm.slane %v272_v17, 6  ;;  %v2191_v30 = vperm.slane %v272_v17, 3  ;;  %v2217_v39 = vperm.slane %v272_v17, 2  ;;  %s2007_s30 = scalar_lea.hbm %s2006_s26, 8  ;;  %p2012_p2 = scmp.lt.s32.totalorder %s2006_s26, %s2977_s5 }
  0x20   : > { %v2219_v40 = vperm.slane %v272_v17, 4  ;;  %v2225_v44 = vperm.slane %v272_v17, 5  ;;  %v2240_v51 = vperm.slane %v272_v17, 7  ;;  %v2243_v52 = vperm.slane %v2200_v34, 0  ;;  %p2008_p13 = scmp.ne.s32.totalorder %s2006_s26, %s2007_s30  ;;  %p2013_p3 = scmp.lt.s32.totalorder %s2011_s7, %s2007_s30 }
  0x21   : > { %v2246_v53 = vperm.slane %v2200_v34, 1  ;;  %v2256_v57 = vperm.slane %v2200_v34, 2 }
  0x22   : > { %p2009_p0 = pnand %p2008_p13, %p2123_p5  ;;  %p2014_p4 = por %p2013_p3, %p2012_p2 }
  0x23   : > { %373 = vmatpush.bf16.msra.mxu0 %v1883_v2 }
  0x24   : > { %p2010_p1 = pneg %p2009_p0 }
  0x26   : > { %p2015_p7 = pnand %p2014_p4, %p2010_p1 }
  0x27   : > { %374 = vmatpush.bf16.msra.mxu0 %v1882_v3 }
  0x2b   : > { %375 = vmatpush.bf16.msra.mxu0 %v1881_v4 }
  0x2f   : > { %376 = vmatpush.bf16.msra.mxu0 %v1880_v5 }
  0x33   : > { %377 = vmatpush.bf16.msra.mxu0 %v1879_v6  ;;  %v1621_v6 = vld [vmem:[%s2973_s1 + $0x90] sm:$0xff] }
  0x37   : > { %378 = vmatpush.bf16.msra.mxu0 %v1878_v7 }
  0x3a   : > { %379 = vmatmul.bf16.vlgmr.msra.gmra.mxu0 %v1874_v8  ;;  %v1629_v8 = vld [vmem:[%s2973_s1 + $0xd0] sm:$0xff] }
  0x4a   : > { %384 = vmatmul.bf16.gmra.mxu0 %v1875_v9 }
  0x5a   : > { %389 = vmatmul.bf16.gmra.mxu0 %v1876_v10 }
  0x6a   : > { %394 = vmatmul.bf16.gmra.mxu0 %v1877_v11  ;;  %v1651_v11 = vld [vmem:[%s2973_s1 + $0x180] sm:$0xff] }
  0xb7   : > { %v380_v13 = vpop.f32.mrf.mxu0 }
  0xb8   : > { %v2168_v18 = vadd.f32 %v380_v13, %v2162_v15  ;;  %v1659_v13 = vld [vmem:[%s2973_s1 + $0x1c0] sm:$0xff] }
  0xba   : > { %v400_v22 = vrot.slane %v2168_v18, 3  ;;  %v2981_v23 = vrot.slane %v2168_v18, 4  ;;  %v2980_v27 = vrot.slane %v2168_v18, 5  ;;  %v2979_v31 = vrot.slane %v2168_v18, 1 }
  0xbb   : > { %v2978_v45 = vrot.slane %v2168_v18, 7  ;;  %v614_v58 = vmul.f32 %v1635_v43, %v2168_v18 }
  0xbf   : > { %v382_v19 = vpop.f32.mrf.mxu0 }
  0xc0   : > { %v2171_v20 = vadd.f32 %v382_v19, %v2162_v15 }
  0xc2   : > { %2989 = vst [vmem:[#allocation5_spill] sm:$0xff] %v2171_v20  ;;  %v401_v24 = vrot.slane %v2171_v20, 3  ;;  %v453_v25 = vrot.slane %v2171_v20, 4  ;;  %v504_v26 = vrot.slane %v2171_v20, 5  ;;  %v640_v33 = vrot.slane %v2171_v20, 1 }
  0xc3   : > { %v555_v35 = vrot.slane %v2171_v20, 7  ;;  %v615_v2 = vmul.f32 %v1636_v49, %v2171_v20 }
  0xc4   : > { %v417_v36 = vsel %vm410_vm0, %v400_v22, %v401_v24  ;;  %v467_v37 = vsel %vm460_vm1, %v2981_v23, %v453_v25  ;;  %v2215_v38 = vsel %vm511_vm2, %v2980_v27, %v504_v26  ;;  %v654_v46 = vsel %vm647_vm4, %v2979_v31, %v640_v33 }
  0xc5   : > { %v479_v41 = vmul.f32 %v1612_v28, %v467_v37  ;;  %v530_v42 = vmul.f32 %v1620_v29, %v2215_v38  ;;  %v428_v48 = vmul.f32 %v420_v32, %v417_v36  ;;  %v569_v59 = vsel %vm562_vm3, %v2978_v45, %v555_v35 }
  0xc6   : > { %v665_v0 = vmul.f32 %v1643_v47, %v654_v46  ;;  %v581_v17 = vmul.f32 %v1628_v60, %v569_v59  ;;  %v2313_v46 = vperm.slane %v2159_v12, 1  ;;  %v2320_v47 = vmul.f32 %v1659_v13, %v467_v37  ;;  %v1644_v37 = vld [vmem:[%s2973_s1 + $0x148] sm:$0xff]  ;;  %v422_v59 = vld [vmem:[%s2973_s1 + $0x18] sm:$0xff] }
  0xc7   : > { %v385_v50 = vpop.f32.mrf.mxu0  ;;  %v488_v54 = vmul.f32 %v2191_v30, %v479_v41  ;;  %v539_v63 = vmul.f32 %v2219_v40, %v530_v42  ;;  %v437_v1 = vmul.f32 %v2217_v39, %v428_v48  ;;  %v1614_v60 = vld [vmem:[%s2973_s1 + $0x58] sm:$0xff] }
  0xc8   : > { %v2250_v55 = vadd.f32 %v385_v50, %v2162_v15  ;;  %v2325_v50 = vmul.f32 %v2240_v51, %v665_v0  ;;  %v590_v12 = vmul.f32 %v2225_v44, %v581_v17  ;;  %v1669_v17 = vld [vmem:[%s2973_s1 + $0x210] sm:$0xff] }
  0xc9   : > { %v496_v14 = vadd.f32 %v488_v54, %v437_v1 }
  0xca   : > { %2990 = vst [vmem:[#allocation6_spill] sm:$0xff] %v2250_v55  ;;  %v402_v3 = vrot.slane %v2250_v55, 3  ;;  %v454_v4 = vrot.slane %v2250_v55, 4  ;;  %v505_v5 = vrot.slane %v2250_v55, 5  ;;  %v556_v7 = vrot.slane %v2250_v55, 7 }
  0xcb   : > { %v616_v9 = vmul.f32 %v1637_v56, %v2250_v55  ;;  %v641_v10 = vrot.slane %v2250_v55, 1  ;;  %v547_v54 = vadd.f32 %v539_v63, %v496_v14  ;;  %v1661_v14 = vld [vmem:[%s2973_s1 + $0x1d0] sm:$0xff] }
  0xcc   : > { %v2295_v19 = vsel %vm410_vm0, %v401_v24, %v402_v3  ;;  %v2299_v28 = vsel %vm460_vm1, %v453_v25, %v454_v4  ;;  %v2303_v29 = vsel %vm511_vm2, %v504_v26, %v505_v5  ;;  %v568_v32 = vsel %vm562_vm3, %v555_v35, %v556_v7 }
  0xcd   : > { %v429_v41 = vmul.f32 %v421_v61, %v2295_v19  ;;  %v480_v42 = vmul.f32 %v1613_v62, %v2299_v28  ;;  %v531_v24 = vmul.f32 %v1621_v6, %v2303_v29  ;;  %v582_v43 = vmul.f32 %v1629_v8, %v568_v32  ;;  %v1622_v6 = vld [vmem:[%s2973_s1 + $0x98] sm:$0xff] }
  0xce   : > { %v2316_v25 = vmul.f32 %v2175_v21, %v614_v58  ;;  %v2318_v26 = vmul.f32 %v1651_v11, %v417_v36  ;;  %v2332_v58 = vmul.f32 %v2175_v21, %v615_v2  ;;  %v653_v36 = vsel %vm647_vm4, %v640_v33, %v641_v10  ;;  %v1645_v11 = vld [vmem:[%s2973_s1 + $0x150] sm:$0xff] }
  0xcf   : > { %v387_v48 = vpop.f32.mrf.mxu0  ;;  %v438_v35 = vmul.f32 %v2217_v39, %v429_v41  ;;  %v489_v49 = vmul.f32 %v2191_v30, %v480_v42  ;;  %v540_v62 = vmul.f32 %v2219_v40, %v531_v24  ;;  %v591_v63 = vmul.f32 %v2225_v44, %v582_v43 }
  0xd0   : > { %v2328_v56 = vadd.f32 %v387_v48, %v2162_v15  ;;  %v625_v0 = vmul.f32 %v2175_v21, %v616_v9  ;;  %v1653_v9 = vld [vmem:[%s2973_s1 + $0x190] sm:$0xff]  ;;  %v2370_v41 = vadd.f32 %v590_v12, %v547_v54  ;;  %v2372_v42 = vmul.f32 %v1644_v37, %v653_v36 }
  0xd1   : > { %v497_v61 = vadd.f32 %v489_v49, %v438_v35  ;;  %v1638_v49 = vld [vmem:[%s2973_s1 + $0x118] sm:$0xff] }
  0xd2   : > { %v403_v33 = vrot.slane %v2328_v56, 3  ;;  %v455_v1 = vrot.slane %v2328_v56, 4  ;;  %v506_v2 = vrot.slane %v2328_v56, 5  ;;  %v642_v8 = vrot.slane %v2328_v56, 1 }
  0xd3   : > { %v548_v13 = vadd.f32 %v540_v62, %v497_v61  ;;  %v557_v32 = vrot.slane %v2328_v56, 7 }
  0xd4   : > { %v415_v24 = vsel %vm410_vm0, %v402_v3, %v403_v33  ;;  %v465_v43 = vsel %vm460_vm1, %v454_v4, %v455_v1  ;;  %v516_v48 = vsel %vm511_vm2, %v505_v5, %v506_v2  ;;  %v652_v35 = vsel %vm647_vm4, %v641_v10, %v642_v8 }
  0xd5   : > { %v430_v54 = vmul.f32 %v422_v59, %v415_v24  ;;  %v481_v12 = vmul.f32 %v1614_v60, %v465_v43  ;;  %v532_v36 = vmul.f32 %v1622_v6, %v516_v48  ;;  %v599_v37 = vadd.f32 %v591_v63, %v548_v13  ;;  %v1630_v6 = vld [vmem:[%s2973_s1 + $0xd8] sm:$0xff] }
  0xd6   : > { %v667_v61 = vmul.f32 %v1645_v11, %v652_v35  ;;  %v701_v62 = vmul.f32 %v1653_v9, %v415_v24  ;;  %v735_v3 = vmul.f32 %v1661_v14, %v465_v43  ;;  %v769_v45 = vmul.f32 %v1669_v17, %v516_v48  ;;  %v423_v17 = vld [vmem:[%s2973_s1 + $0x20] sm:$0xff] }
  0xd7   : > { %v390_v31 = vpop.f32.mrf.mxu0  ;;  %v439_v4 = vmul.f32 %v2217_v39, %v430_v54  ;;  %v490_v5 = vmul.f32 %v2191_v30, %v481_v12  ;;  %v633_v27 = vadd.f32 %v625_v0, %v599_v37  ;;  %v617_v10 = vmul.f32 %v1638_v49, %v2328_v56  ;;  %v1623_v48 = vld [vmem:[%s2973_s1 + $0xa0] sm:$0xff]  ;;  %v1654_v54 = vld [vmem:[%s2973_s1 + $0x198] sm:$0xff] }
  0xd8   : > { %v2389_v23 = vadd.f32 %v390_v31, %v2162_v15  ;;  %v541_v59 = vmul.f32 %v2219_v40, %v532_v36  ;;  %v676_v60 = vmul.f32 %v2240_v51, %v667_v61  ;;  %v710_v63 = vmul.f32 %v2243_v52, %v701_v62  ;;  %v1662_v12 = vld [vmem:[%s2973_s1 + $0x1d8] sm:$0xff] }
  0xd9   : > { %v498_v11 = vadd.f32 %v490_v5, %v439_v4  ;;  %v744_v13 = vmul.f32 %v2246_v53, %v735_v3  ;;  %v778_v0 = vmul.f32 %v2256_v57, %v769_v45  ;;  %v567_v31 = vsel %vm562_vm3, %v556_v7, %v557_v32  ;;  %v1615_v45 = vld [vmem:[%s2973_s1 + $0x60] sm:$0xff] }
  0xda   : > { %v684_v9 = vadd.f32 %v676_v60, %v633_v27  ;;  %v404_v14 = vrot.slane %v2389_v23, 3  ;;  %v456_v24 = vrot.slane %v2389_v23, 4  ;;  %v507_v43 = vrot.slane %v2389_v23, 5 }
  0xdb   : > { %v549_v7 = vadd.f32 %v541_v59, %v498_v11  ;;  %v583_v27 = vmul.f32 %v1630_v6, %v567_v31  ;;  %v626_v35 = vmul.f32 %v2175_v21, %v617_v10  ;;  %v643_v49 = vrot.slane %v2389_v23, 1  ;;  %v1646_v59 = vld [vmem:[%s2973_s1 + $0x158] sm:$0xff] }
  0xdc   : > { %v718_v36 = vadd.f32 %v710_v63, %v684_v9  ;;  %v414_v37 = vsel %vm410_vm0, %v403_v33, %v404_v14  ;;  %v464_v61 = vsel %vm460_vm1, %v455_v1, %v456_v24  ;;  %v515_v62 = vsel %vm511_vm2, %v506_v2, %v507_v43 }
  0xdd   : > { %v431_v3 = vmul.f32 %v423_v17, %v414_v37  ;;  %v482_v4 = vmul.f32 %v1615_v45, %v464_v61  ;;  %v533_v5 = vmul.f32 %v1623_v48, %v515_v62  ;;  %v592_v10 = vmul.f32 %v2225_v44, %v583_v27 }
  0xde   : > { %v752_v60 = vadd.f32 %v744_v13, %v718_v36  ;;  %v651_v33 = vsel %vm647_vm4, %v642_v8, %v643_v49  ;;  %v702_v63 = vmul.f32 %v1654_v54, %v414_v37  ;;  %v736_v1 = vmul.f32 %v1662_v12, %v464_v61  ;;  %v1670_v8 = vld [vmem:[%s2973_s1 + $0x218] sm:$0xff] }
  0xdf   : > { %v392_v6 = vpop.f32.mrf.mxu0  ;;  %v440_v2 = vmul.f32 %v2217_v39, %v431_v3  ;;  %v491_v11 = vmul.f32 %v2191_v30, %v482_v4  ;;  %v600_v31 = vadd.f32 %v592_v10, %v549_v7  ;;  %v558_v9 = vrot.slane %v2389_v23, 7  ;;  %v1631_v7 = vld [vmem:[%s2973_s1 + $0xe0] sm:$0xff]  ;;  %v424_v3 = vld [vmem:[%s2973_s1 + $0x28] sm:$0xff] }
  0xe0   : > { %v2443_v17 = vadd.f32 %v392_v6, %v2162_v15  ;;  %v786_v45 = vadd.f32 %v778_v0, %v752_v60  ;;  %v542_v13 = vmul.f32 %v2219_v40, %v533_v5  ;;  %v668_v48 = vmul.f32 %v1646_v59, %v651_v33  ;;  %v1616_v4 = vld [vmem:[%s2973_s1 + $0x68] sm:$0xff]  ;;  %v1639_v5 = vld [vmem:[%s2973_s1 + $0x120] sm:$0xff] }
  0xe1   : > { %v499_v27 = vadd.f32 %v491_v11, %v440_v2  ;;  %v634_v54 = vadd.f32 %v626_v35, %v600_v31  ;;  %v711_v12 = vmul.f32 %v2243_v52, %v702_v63  ;;  %v745_v36 = vmul.f32 %v2246_v53, %v736_v1  ;;  %v1624_v33 = vld [vmem:[%s2973_s1 + $0xa8] sm:$0xff]  ;;  %v1655_v11 = vld [vmem:[%s2973_s1 + $0x1a0] sm:$0xff] }
  0xe2   : > { %v2455_v37 = vadd.f32 %v2313_v46, %v786_v45  ;;  %v677_v0 = vmul.f32 %v2240_v51, %v668_v48  ;;  %v405_v61 = vrot.slane %v2443_v17, 3  ;;  %v457_v35 = vrot.slane %v2443_v17, 4 }
  0xe3   : > { %v550_v10 = vadd.f32 %v542_v13, %v499_v27  ;;  %v770_v59 = vmul.f32 %v1670_v8, %v515_v62  ;;  %v508_v60 = vrot.slane %v2443_v17, 5  ;;  %v566_v63 = vsel %vm562_vm3, %v557_v32, %v558_v9 }
  0xe4   : > { %805 = vadd.xlane.f32.xlu1 %v2455_v37  ;;  %v685_v1 = vadd.f32 %v677_v0, %v634_v54  ;;  %v413_v6 = vsel %vm410_vm0, %v404_v14, %v405_v61  ;;  %v463_v62 = vsel %vm460_vm1, %v456_v24, %v457_v35  ;;  %v584_v2 = vmul.f32 %v1631_v7, %v566_v63  ;;  %v1663_v24 = vld [vmem:[%s2973_s1 + $0x1e0] sm:$0xff] }
  0xe5   : > { %v432_v31 = vmul.f32 %v424_v3, %v413_v6  ;;  %v483_v45 = vmul.f32 %v1616_v4, %v463_v62  ;;  %v514_v13 = vsel %vm511_vm2, %v507_v43, %v508_v60  ;;  %v618_v32 = vmul.f32 %v1639_v5, %v2389_v23  ;;  %v1647_v43 = vld [vmem:[%s2973_s1 + $0x160] sm:$0xff] }
  0xe6   : > { %v719_v48 = vadd.f32 %v711_v12, %v685_v1  ;;  %v534_v8 = vmul.f32 %v1624_v33, %v514_v13  ;;  %v593_v27 = vmul.f32 %v2225_v44, %v584_v2  ;;  %v644_v14 = vrot.slane %v2443_v17, 1 }
  0xe7   : > { %v395_v54 = vpop.f32.mrf.mxu0  ;;  %v779_v7 = vmul.f32 %v2256_v57, %v770_v59  ;;  %v441_v0 = vmul.f32 %v2217_v39, %v432_v31  ;;  %v492_v3 = vmul.f32 %v2191_v30, %v483_v45  ;;  %v703_v12 = vmul.f32 %v1655_v11, %v413_v6  ;;  %v1671_v59 = vld [vmem:[%s2973_s1 + $0x220] sm:$0xff] }
  0xe8   : > { %v2502_v4 = vadd.f32 %v395_v54, %v2162_v15  ;;  %v753_v5 = vadd.f32 %v745_v36, %v719_v48  ;;  %v601_v33 = vadd.f32 %v593_v27, %v550_v10  ;;  %v627_v63 = vmul.f32 %v2175_v21, %v618_v32  ;;  %v425_v54 = vld [vmem:[%s2973_s1 + $0x30] sm:$0xff] }
  0xe9   : > { %v500_v1 = vadd.f32 %v492_v3, %v441_v0  ;;  %v650_v2 = vsel %vm647_vm4, %v643_v49, %v644_v14  ;;  %v737_v31 = vmul.f32 %v1663_v24, %v463_v62  ;;  %v2514_v6 = vadd.f32 %v2332_v58, %v2370_v41  ;;  %v1617_v58 = vld [vmem:[%s2973_s1 + $0x70] sm:$0xff] }
  0xea   : > { %v787_v11 = vadd.f32 %v779_v7, %v753_v5  ;;  %v543_v36 = vmul.f32 %v2219_v40, %v534_v8  ;;  %v635_v10 = vadd.f32 %v627_v63, %v601_v33  ;;  %v669_v45 = vmul.f32 %v1647_v43, %v650_v2  ;;  %v1625_v24 = vld [vmem:[%s2973_s1 + $0xb0] sm:$0xff]  ;;  %v1640_v7 = vld [vmem:[%s2973_s1 + $0x128] sm:$0xff] }
  0xeb   : > { %v712_v32 = vmul.f32 %v2243_v52, %v703_v12  ;;  %v771_v48 = vmul.f32 %v1671_v59, %v514_v13  ;;  %v406_v27 = vrot.slane %v2502_v4, 3  ;;  %v458_v49 = vrot.slane %v2502_v4, 4 }
  0xec   : > { %v2527_v41 = vadd.f32 %v2313_v46, %v787_v11  ;;  %v551_v62 = vadd.f32 %v543_v36, %v500_v1  ;;  %v678_v8 = vmul.f32 %v2240_v51, %v669_v45  ;;  %v509_v13 = vrot.slane %v2502_v4, 5  ;;  %v1648_v36 = vld [vmem:[%s2973_s1 + $0x168] sm:$0xff] }
  0xed   : > { %v746_v0 = vmul.f32 %v2246_v53, %v737_v31  ;;  %v412_v3 = vsel %vm410_vm0, %v405_v61, %v406_v27  ;;  %v462_v43 = vsel %vm460_vm1, %v457_v35, %v458_v49  ;;  %v2982_v12 = vrot.slane %v2443_v17, 7  ;;  %v1632_v61 = vld [vmem:[%s2973_s1 + $0xe8] sm:$0xff] }
  0xee   : > { %807 = vadd.xlane.f32.xlu1 %v2527_v41  ;;  %v686_v5 = vadd.f32 %v678_v8, %v635_v10  ;;  %v433_v33 = vmul.f32 %v425_v54, %v412_v3  ;;  %v484_v63 = vmul.f32 %v1617_v58, %v462_v43  ;;  %v513_v59 = vsel %vm511_vm2, %v508_v60, %v509_v13  ;;  %v1656_v35 = vld [vmem:[%s2973_s1 + $0x1a8] sm:$0xff] }
  0xef   : > { %v397_v1 = vpop.f32.mrf.mxu0  ;;  %v535_v2 = vmul.f32 %v1625_v24, %v513_v59  ;;  %v565_v31 = vsel %vm562_vm3, %v558_v9, %v2982_v12  ;;  %v619_v11 = vmul.f32 %v1640_v7, %v2443_v17  ;;  %v2983_v60 = vrot.slane %v2502_v4, 1  ;;  %v1664_v9 = vld [vmem:[%s2973_s1 + $0x1e8] sm:$0xff] }
  0xf0   : > { %v2568_v10 = vadd.f32 %v397_v1, %v2162_v15  ;;  %v720_v45 = vadd.f32 %v712_v32, %v686_v5  ;;  %v442_v54 = vmul.f32 %v2217_v39, %v433_v33  ;;  %v493_v58 = vmul.f32 %v2191_v30, %v484_v63  ;;  %v1672_v15 = vld [vmem:[%s2973_s1 + $0x228] sm:$0xff] }
  0xf1   : > { %v780_v8 = vmul.f32 %v2256_v57, %v771_v48  ;;  %v585_v24 = vmul.f32 %v1632_v61, %v565_v31  ;;  %v649_v7 = vsel %vm647_vm4, %v644_v14, %v2983_v60  ;;  %v704_v12 = vmul.f32 %v1656_v35, %v412_v3  ;;  %v426_v14 = vld [vmem:[%s2973_s1 + $0x38] sm:$0xff] }
  0xf2   : > { %v754_v32 = vadd.f32 %v746_v0, %v720_v45  ;;  %v501_v5 = vadd.f32 %v493_v58, %v442_v54  ;;  %v544_v33 = vmul.f32 %v2219_v40, %v535_v2  ;;  %v670_v63 = vmul.f32 %v1648_v36, %v649_v7  ;;  %v1642_v2 = vld [vmem:[%s2973_s1 + $0x138] sm:$0xff] }
  0xf3   : > { %v594_v1 = vmul.f32 %v2225_v44, %v585_v24  ;;  %v628_v48 = vmul.f32 %v2175_v21, %v619_v11  ;;  %v738_v61 = vmul.f32 %v1664_v9, %v462_v43  ;;  %v407_v31 = vrot.slane %v2568_v10, 3  ;;  %v1626_v24 = vld [vmem:[%s2973_s1 + $0xb8] sm:$0xff] }
  0xf4   : > { %v788_v3 = vadd.f32 %v780_v8, %v754_v32  ;;  %v2590_v35 = vadd.f32 %v544_v33, %v501_v5  ;;  %v713_v0 = vmul.f32 %v2243_v52, %v704_v12  ;;  %v772_v45 = vmul.f32 %v1672_v15, %v513_v59 }
  0xf5   : > { %v602_v36 = vadd.f32 %v594_v1, %v551_v62  ;;  %v679_v11 = vmul.f32 %v2240_v51, %v670_v63  ;;  %v2599_v43 = vsel %vm410_vm0, %v406_v27, %v407_v31  ;;  %v418_v54 = vsel %vm410_vm0, %v407_v31, %v400_v22  ;;  %v1611_v62 = vld [vmem:[%s2973_s1 + $0x40] sm:$0xff]  ;;  %v1618_v27 = vld [vmem:[%s2973_s1 + $0x78] sm:$0xff] }
  0xf6   : > { %v2606_v58 = vadd.f32 %v2313_v46, %v788_v3  ;;  %v434_v12 = vmul.f32 %v426_v14, %v2599_v43  ;;  %v459_v59 = vrot.slane %v2568_v10, 4  ;;  %v510_v9 = vrot.slane %v2568_v10, 5  ;;  %v1619_v22 = vld [vmem:[%s2973_s1 + $0x80] sm:$0xff]  ;;  %v1634_v31 = vld [vmem:[%s2973_s1 + $0xf8] sm:$0xff] }
  0xf7   : > { %v636_v8 = vadd.f32 %v628_v48, %v602_v36  ;;  %v2984_v7 = vrot.slane %v2502_v4, 7  ;;  %v561_v15 = vrot.slane %v2568_v10, 7  ;;  %v621_v32 = vmul.f32 %v1642_v2, %v2568_v10 }
  0xf8   : > { %809 = vadd.xlane.f32.xlu2 %v2606_v58  ;;  %v443_v5 = vmul.f32 %v2217_v39, %v434_v12  ;;  %v2632_v33 = vsel %vm460_vm1, %v458_v49, %v459_v59  ;;  %v2991_v63 = vrot.slane %v2168_v18, 4  ;;  %v2642_v48 = vsel %vm511_vm2, %v509_v13, %v510_v9  ;;  %v1658_v12 = vld [vmem:[%s2973_s1 + $0x1b8] sm:$0xff] }
  0xf9   : > { %v687_v14 = vadd.f32 %v679_v11, %v636_v8  ;;  %v485_v49 = vmul.f32 %v1618_v27, %v2632_v33  ;;  %v2992_v2 = vrot.slane %v2168_v18, 5  ;;  %v747_v13 = vmul.f32 %v2246_v53, %v738_v61  ;;  %v419_v8 = vld [vmem:[%s2973_s1] sm:$0xff] }
  0xfa   : > { %v468_v1 = vsel %vm460_vm1, %v459_v59, %v2991_v63  ;;  %v536_v63 = vmul.f32 %v1626_v24, %v2642_v48  ;;  %v563_v11 = vsel %vm562_vm3, %v2984_v7, %v561_v15  ;;  %v646_v60 = vrot.slane %v2568_v10, 1  ;;  %v1650_v7 = vld [vmem:[%s2973_s1 + $0x178] sm:$0xff] }
  0xfb   : > { %v478_v3 = vmul.f32 %v1611_v62, %v468_v1  ;;  %v519_v36 = vsel %vm511_vm2, %v510_v9, %v2992_v2  ;;  %v1666_v62 = vld [vmem:[%s2973_s1 + $0x1f8] sm:$0xff]  ;;  %v721_v27 = vadd.f32 %v713_v0, %v687_v14  ;;  %v781_v9 = vmul.f32 %v2256_v57, %v772_v45 }
  0xfc   : > { %v529_v59 = vmul.f32 %v1619_v22, %v519_v36  ;;  %v494_v61 = vmul.f32 %v2191_v30, %v485_v49  ;;  %v587_v22 = vmul.f32 %v1634_v31, %v563_v11  ;;  %v630_v2 = vmul.f32 %v2175_v21, %v621_v32  ;;  %v1674_v31 = vld [vmem:[%s2973_s1 + $0x238] sm:$0xff] }
  0xfd   : > { %v487_v24 = vmul.f32 %v2191_v30, %v478_v3  ;;  %v706_v0 = vmul.f32 %v1658_v12, %v418_v54  ;;  %v755_v14 = vadd.f32 %v747_v13, %v721_v27  ;;  %v545_v20 = vmul.f32 %v2219_v40, %v536_v63 }
  0xfe   : > { %v502_v45 = vadd.f32 %v494_v61, %v443_v5  ;;  %v740_v55 = vmul.f32 %v1666_v62, %v468_v1  ;;  %v538_v30 = vmul.f32 %v2219_v40, %v529_v59  ;;  %v596_v32 = vmul.f32 %v2225_v44, %v587_v22  ;;  %v1627_v5 = vld [vmem:[%s2973_s1 + $0xc0] sm:$0xff]  ;;  %v1652_v40 = vld [vmem:[%s2973_s1 + $0x188] sm:$0xff] }
  0xff   : > { %v2993_v3 = vrot.slane %v2168_v18, 1  ;;  %v427_v11 = vmul.f32 %v419_v8, %v418_v54  ;;  %v789_v12 = vadd.f32 %v781_v9, %v755_v14  ;;  %v715_v63 = vmul.f32 %v2243_v52, %v706_v0  ;;  %v1660_v59 = vld [vmem:[%s2973_s1 + $0x1c8] sm:$0xff] }
 0x100   : > { %v553_v1 = vadd.f32 %v545_v20, %v502_v45  ;;  %v774_v62 = vmul.f32 %v1674_v31, %v519_v36  ;;  %v2994_v27 = vrot.slane %v2168_v18, 7  ;;  %v675_v20 = vmul.f32 %v2240_v51, %v2372_v42  ;;  %v1641_v45 = vld [vmem:[%s2973_s1 + $0x130] sm:$0xff] }
 0x101   : > { %v655_v49 = vsel %vm647_vm4, %v646_v60, %v2993_v3  ;;  %v436_v54 = vmul.f32 %v2217_v39, %v427_v11  ;;  %v2706_v8 = vadd.f32 %v2313_v46, %v789_v12  ;;  %v749_v36 = vmul.f32 %v2246_v53, %v740_v55  ;;  %v1633_v39 = vld [vmem:[%s2973_s1 + $0xf0] sm:$0xff] }
 0x102   : > { %v672_v13 = vmul.f32 %v1650_v7, %v655_v49  ;;  %v570_v9 = vsel %vm562_vm3, %v561_v15, %v2994_v27  ;;  %v1668_v7 = vld [vmem:[%s2973_s1 + $0x208] sm:$0xff]  ;;  %v604_v61 = vadd.f32 %v596_v32, %v553_v1  ;;  %v683_v15 = vadd.f32 %v675_v20, %v2514_v6 }
 0x103   : > { %v580_v22 = vmul.f32 %v1627_v5, %v570_v9  ;;  %v495_v0 = vadd.f32 %v487_v24, %v436_v54  ;;  %v700_v42 = vmul.f32 %v1652_v40, %v2295_v19  ;;  %v734_v14 = vmul.f32 %v1660_v59, %v2299_v28  ;;  %811 = vadd.xlane.f32.xlu2 %v2706_v8  ;;  %v1649_v28 = vld [vmem:[%s2973_s1 + $0x170] sm:$0xff]  ;;  %v1667_v59 = vld [vmem:[%s2973_s1 + $0x200] sm:$0xff] }
 0x104   : > { %v638_v31 = vadd.f32 %v630_v2, %v604_v61  ;;  %v681_v55 = vmul.f32 %v2240_v51, %v672_v13  ;;  %v768_v32 = vmul.f32 %v1668_v7, %v2303_v29  ;;  %v2995_v3 = vrot.slane %v2502_v4, 7  ;;  %v1657_v29 = vld [vmem:[%s2973_s1 + $0x1b0] sm:$0xff] }
 0x105   : > { %v2996_v24 = vrot.slane %v2443_v17, 7  ;;  %v546_v6 = vadd.f32 %v538_v30, %v495_v0  ;;  %v589_v49 = vmul.f32 %v2225_v44, %v580_v22  ;;  %v709_v2 = vmul.f32 %v2243_v52, %v700_v42 }
 0x106   : > { %v689_v5 = vadd.f32 %v681_v55, %v638_v31  ;;  %v743_v12 = vmul.f32 %v2246_v53, %v734_v14  ;;  %v620_v1 = vmul.f32 %v1641_v45, %v2502_v4  ;;  %v2997_v13 = vrot.slane %v2502_v4, 1 }
 0x107   : > { %v564_v19 = vsel %vm562_vm3, %v2996_v24, %v2995_v3  ;;  %v597_v30 = vadd.f32 %v589_v49, %v546_v6  ;;  %v717_v54 = vadd.f32 %v709_v2, %v683_v15  ;;  %v777_v7 = vmul.f32 %v2256_v57, %v768_v32 }
 0x108   : > { %v586_v11 = vmul.f32 %v1633_v39, %v564_v19  ;;  %v648_v40 = vsel %vm647_vm4, %v2997_v13, %v646_v60  ;;  %v723_v20 = vadd.f32 %v715_v63, %v689_v5  ;;  %v629_v61 = vmul.f32 %v2175_v21, %v620_v1 }
 0x109   : > { %v671_v9 = vmul.f32 %v1649_v28, %v648_v40  ;;  %v705_v22 = vmul.f32 %v1657_v29, %v2599_v43  ;;  %v631_v60 = vadd.f32 %v2316_v25, %v597_v30  ;;  %v751_v39 = vadd.f32 %v743_v12, %v717_v54  ;;  %v1673_v43 = vld [vmem:[%s2973_s1 + $0x230] sm:$0xff] }
 0x10a   : > { %v595_v27 = vmul.f32 %v2225_v44, %v586_v11  ;;  %v757_v44 = vadd.f32 %v749_v36, %v723_v20  ;;  %v783_v63 = vmul.f32 %v2256_v57, %v774_v62  ;;  %v708_v42 = vmul.f32 %v2243_v52, %v2318_v26 }
 0x10b   : > { %v680_v15 = vmul.f32 %v2240_v51, %v671_v9  ;;  %v767_v21 = vmul.f32 %v1667_v59, %v2215_v38  ;;  %v682_v14 = vadd.f32 %v2325_v50, %v631_v60  ;;  %v785_v25 = vadd.f32 %v777_v7, %v751_v39 }
 0x10c   : > { %v603_v0 = vadd.f32 %v595_v27, %v2590_v35  ;;  %v739_v35 = vmul.f32 %v1665_v16, %v2632_v33  ;;  %v791_v31 = vadd.f32 %v783_v63, %v757_v44  ;;  %v742_v51 = vmul.f32 %v2246_v53, %v2320_v47 }
 0x10d   : > { %v716_v62 = vadd.f32 %v708_v42, %v682_v14  ;;  %v714_v26 = vmul.f32 %v2243_v52, %v705_v22  ;;  %v773_v38 = vmul.f32 %v1673_v43, %v2642_v48  ;;  %v776_v50 = vmul.f32 %v2256_v57, %v767_v21 }
 0x10e   : > { %v637_v45 = vadd.f32 %v629_v61, %v603_v0  ;;  %v2768_v55 = vadd.f32 %v2313_v46, %v791_v31  ;;  %v748_v24 = vmul.f32 %v2246_v53, %v739_v35  ;;  %v794_v6 = vadd.f32 %v2313_v46, %v785_v25 }
 0x10f   : > { %v750_v32 = vadd.f32 %v742_v51, %v716_v62  ;;  %v782_v47 = vmul.f32 %v2256_v57, %v773_v38  ;;  %v833_v53 = vperm.slane %v2200_v34, 3  ;;  %v1893_v51 = vld [vmem:[%s2137_s9 + $0x78] sm:$0xff]  ;;  %v1892_v62 = vld [vmem:[%s2137_s9 + $0x70] sm:$0xff] }
 0x110   : > { %v688_v36 = vadd.f32 %v680_v15, %v637_v45  ;;  %815 = vadd.xlane.f32.xlu1 %v2768_v55  ;;  %1058 = vmatpush.bf16.msra.mxu1 %v1893_v51 }
 0x111   : > { %v784_v33 = vadd.f32 %v776_v50, %v750_v32 }
 0x112   : > { %v722_v3 = vadd.f32 %v714_v26, %v688_v36  ;;  %v1891_v36 = vld [vmem:[%s2137_s9 + $0x68] sm:$0xff] }
 0x113   : > { %v793_v28 = vadd.f32 %v2313_v46, %v784_v33 }
 0x114   : > { %v756_v19 = vadd.f32 %v748_v24, %v722_v3  ;;  %1059 = vmatpush.bf16.msra.mxu1 %v1892_v62  ;;  %v1890_v3 = vld [vmem:[%s2137_s9 + $0x60] sm:$0xff] }
 0x115   : > { %801 = vadd.xlane.f32.xlu0 %v793_v28 }
 0x116   : > { %v790_v52 = vadd.f32 %v782_v47, %v756_v19  ;;  %v1889_v47 = vld [vmem:[%s2137_s9 + $0x58] sm:$0xff] }
 0x118   : > { %v799_v48 = vadd.f32 %v2313_v46, %v790_v52  ;;  %1060 = vmatpush.bf16.msra.mxu1 %v1891_v36 }
 0x11c   : > { %1061 = vmatpush.bf16.msra.mxu1 %v1890_v3 }
 0x11d   : > { %803 = vadd.xlane.f32.xlu0 %v794_v6 }
 0x120   : > { %1062 = vmatpush.bf16.msra.mxu1 %v1889_v47 }
 0x125   : > { %813 = vadd.xlane.f32.xlu0 %v799_v48 }
 0x157   : > { %v806_v49 = vpop.xlane.xlu1 %805 }
 0x158   : > { %v819_v2 = vmul.f32 0.03125, %v806_v49 }
 0x15a   : > { %v827_v11 = vsub.f32 %v2455_v37, %v819_v2 }
 0x15c   : > { %v2779_v29 = vmul.f32 %v833_v53, %v827_v11  ;;  %v1888_v11 = vld [vmem:[%s2137_s9 + $0x50] sm:$0xff] }
 0x15d   : > { %1063 = vmatpush.bf16.msra.mxu1 %v1888_v11 }
 0x15e   : > { %v844_v57 = vmul.f32 %v2779_v29, %v2779_v29 }
 0x160   : > { %854 = vadd.xlane.f32.xlu1 %v844_v57 }
 0x161   : > { %v808_v34 = vpop.xlane.xlu1 %807 }
 0x162   : > { %v820_v59 = vmul.f32 0.03125, %v808_v34 }
 0x164   : > { %v828_v9 = vsub.f32 %v2527_v41, %v820_v59 }
 0x166   : > { %v2793_v16 = vmul.f32 %v833_v53, %v828_v9  ;;  %v1886_v9 = vld [vmem:[%s2137_s9 + $0x40] sm:$0xff] }
 0x168   : > { %v845_v0 = vmul.f32 %v2793_v16, %v2793_v16 }
 0x16b   : > { %v810_v5 = vpop.xlane.xlu2 %809 }
 0x16c   : > { %v821_v61 = vmul.f32 0.03125, %v810_v5 }
 0x16e   : > { %v829_v39 = vsub.f32 %v2606_v58, %v821_v61 }
 0x170   : > { %v2802_v43 = vmul.f32 %v833_v53, %v829_v39 }
 0x172   : > { %v846_v25 = vmul.f32 %v2802_v43, %v2802_v43 }
 0x176   : > { %v812_v12 = vpop.xlane.xlu2 %811 }
 0x177   : > { %v822_v1 = vmul.f32 0.03125, %v812_v12  ;;  %v1887_v12 = vld [vmem:[%s2137_s9 + $0x48] sm:$0xff] }
 0x178   : > { %1064 = vmatpush.bf16.msra.mxu1 %v1887_v12 }
 0x179   : > { %v830_v13 = vsub.f32 %v2706_v8, %v822_v1 }
 0x17b   : > { %v2784_v46 = vmul.f32 %v833_v53, %v830_v13 }
 0x17c   : > { %1065 = vmatpush.bf16.msra.mxu1 %v1886_v9 }
 0x17d   : > { %v847_v40 = vmul.f32 %v2784_v46, %v2784_v46 }
 0x17f   : > { %860 = vadd.xlane.f32.xlu1 %v847_v40 }
 0x183   : > { %v816_v15 = vpop.xlane.xlu1 %815 }
 0x184   : > { %v824_v42 = vmul.f32 0.03125, %v816_v15 }
 0x186   : > { %v832_v58 = vsub.f32 %v2768_v55, %v824_v42 }
 0x188   : > { %v802_v30 = vpop.xlane.xlu0 %801  ;;  %v2811_v35 = vmul.f32 %v833_v53, %v832_v58 }
 0x189   : > { %v817_v37 = vmul.f32 0.03125, %v802_v30 }
 0x18a   : > { %v849_v31 = vmul.f32 %v2811_v35, %v2811_v35 }
 0x18b   : > { %v825_v54 = vsub.f32 %v793_v28, %v817_v37 }
 0x18d   : > { %v2788_v27 = vmul.f32 %v833_v53, %v825_v54 }
 0x18f   : > { %v842_v20 = vmul.f32 %v2788_v27, %v2788_v27 }
 0x190   : > { %v804_v7 = vpop.xlane.xlu0 %803 }
 0x191   : > { %v818_v8 = vmul.f32 0.03125, %v804_v7  ;;  %850 = vadd.xlane.f32.xlu2 %v842_v20 }
 0x193   : > { %v826_v22 = vsub.f32 %v794_v6, %v818_v8 }
 0x195   : > { %v2795_v60 = vmul.f32 %v833_v53, %v826_v22 }
 0x197   : > { %v843_v41 = vmul.f32 %v2795_v60, %v2795_v60 }
 0x198   : > { %v814_v44 = vpop.xlane.xlu0 %813 }
 0x199   : > { %v823_v63 = vmul.f32 0.03125, %v814_v44  ;;  %856 = vadd.xlane.f32.xlu2 %v845_v0  ;;  %852 = vadd.xlane.f32.xlu0 %v843_v41 }
 0x19b   : > { %v831_v21 = vsub.f32 %v799_v48, %v823_v63 }
 0x19d   : > { %v2804_v14 = vmul.f32 %v833_v53, %v831_v21 }
 0x19f   : > { %v848_v45 = vmul.f32 %v2804_v14, %v2804_v14 }
 0x1a1   : > { %858 = vadd.xlane.f32.xlu0 %v846_v25  ;;  %862 = vadd.xlane.f32.xlu2 %v848_v45  ;;  %v2847_v45 = vld [vmem:[%s2156_s25] sm:$0xff] }
 0x1a9   : > { %864 = vadd.xlane.f32.xlu0 %v849_v31  ;;  %v2850_v31 = vperm.slane %v2847_v45, 2 }
 0x1d3   : > { %v855_v38 = vpop.xlane.xlu1 %854 }
 0x1d4   : > { %v868_v50 = vmul.f32 0.03125, %v855_v38 }
 0x1d6   : > { %v2819_v24 = vadd.f32 1e-06, %v868_v50 }
 0x1d8   : > { %vm908_vm15 = vweird.f32 %v2819_v24 }
 0x1f2   : > { %v861_v1 = vpop.xlane.xlu1 %860 }
 0x1f3   : > { %v871_v59 = vmul.f32 0.03125, %v861_v1 }
 0x1f5   : > { %v2840_v0 = vadd.f32 1e-06, %v871_v59 }
 0x204   : > { %v851_v26 = vpop.xlane.xlu2 %850 }
 0x205   : > { %v866_v55 = vmul.f32 0.03125, %v851_v26 }
 0x207   : > { %v874_v32 = vadd.f32 1e-06, %v866_v55 }
 0x209   : > { %1957 = vrsqrt.f32 %v874_v32  ;;  %vm888_vm6 = vweird.f32 %v874_v32 }
 0x20a   : > { %1959 = vrsqrt.f32 %v2819_v24 }
 0x20c   : > { %v857_v33 = vpop.xlane.xlu2 %856  ;;  %v853_v19 = vpop.xlane.xlu0 %852 }
 0x20d   : > { %v869_v28 = vmul.f32 0.03125, %v857_v33  ;;  %v867_v52 = vmul.f32 0.03125, %v853_v19  ;;  %v2856_v19 = vperm.slane %v2847_v45, 3 }
 0x20f   : > { %v1958_v48 = vpop.eup %1957  ;;  %v2822_v6 = vadd.f32 1e-06, %v869_v28  ;;  %v875_v49 = vadd.f32 1e-06, %v867_v52 }
 0x210   : > { %v883_v2 = vmul.f32 %v1958_v48, %v874_v32  ;;  %v2828_v13 = vpop.eup %1959  ;;  %vm889_vm5 = vweird.f32 %v1958_v48 }
 0x211   : > { %1961 = vrsqrt.f32 %v2822_v6  ;;  %v903_v20 = vmul.f32 %v2828_v13, %v2819_v24  ;;  %vm890_vm7 = vmor %vm888_vm6, %vm889_vm5  ;;  %vm898_vm9 = vweird.f32 %v875_v49  ;;  %vm909_vm12 = vweird.f32 %v2828_v13 }
 0x212   : > { %v884_v53 = vmul.f32 %v1958_v48, %v883_v2  ;;  %1963 = vrsqrt.f32 %v875_v49  ;;  %vm918_vm13 = vweird.f32 %v2822_v6  ;;  %vm910_vm0 = vmor %vm908_vm15, %vm909_vm12  ;;  %vm938_vm5 = vweird.f32 %v2840_v0 }
 0x213   : > { %v904_v41 = vmul.f32 %v2828_v13, %v903_v20 }
 0x214   : > { %v885_v57 = vmul.f32 0.5, %v884_v53  ;;  %v859_v5 = vpop.xlane.xlu0 %858  ;;  %v863_v50 = vpop.xlane.xlu2 %862 }
 0x215   : > { %v870_v34 = vmul.f32 0.03125, %v859_v5  ;;  %v905_v58 = vmul.f32 0.5, %v904_v41  ;;  %v872_v52 = vmul.f32 0.03125, %v863_v50 }
 0x216   : > { %v886_v40 = vsub.f32 1.5, %v885_v57 }
 0x217   : > { %v2830_v30 = vpop.eup %1961  ;;  %v2837_v61 = vadd.f32 1e-06, %v870_v34  ;;  %v906_v32 = vsub.f32 1.5, %v905_v58  ;;  %v880_v12 = vadd.f32 1e-06, %v872_v52 }
 0x218   : > { %v1964_v37 = vpop.eup %1963  ;;  %v913_v54 = vmul.f32 %v2830_v30, %v2822_v6  ;;  %v887_v7 = vmul.f32 %v1958_v48, %v886_v40  ;;  %vm919_vm11 = vweird.f32 %v2830_v30 }
 0x219   : > { %v893_v8 = vmul.f32 %v1964_v37, %v875_v49  ;;  %1965 = vrsqrt.f32 %v2837_v61  ;;  %vm899_vm8 = vweird.f32 %v1964_v37  ;;  %v907_v49 = vmul.f32 %v2828_v13, %v906_v32  ;;  %vm920_vm14 = vmor %vm918_vm13, %vm919_vm11 }
 0x21a   : > { %v914_v22 = vmul.f32 %v2830_v30, %v913_v54  ;;  %v891_v44 = vsel %vm890_vm7, %v1958_v48, %v887_v7  ;;  %1967 = vrsqrt.f32 %v2840_v0  ;;  %vm900_vm10 = vmor %vm898_vm9, %vm899_vm8  ;;  %vm928_vm3 = vweird.f32 %v2837_v61 }
 0x21b   : > { %v894_v39 = vmul.f32 %v1964_v37, %v893_v8  ;;  %v962_v21 = vmul.f32 %v891_v44, %v2788_v27  ;;  %v911_v40 = vsel %vm910_vm0, %v2828_v13, %v907_v49  ;;  %vm948_vm11 = vweird.f32 %v880_v12  ;;  %v1900_v49 = vld [vmem:[%s2137_s9 + $0xb0] sm:$0xff] }
 0x21c   : > { %v915_v63 = vmul.f32 0.5, %v914_v22  ;;  %v865_v62 = vpop.xlane.xlu0 %864  ;;  %v964_v6 = vmul.f32 %v911_v40, %v2779_v29  ;;  %vm1271_vm13 = vcmask 523264  }
 0x21d   : > { %v895_v15 = vmul.f32 0.5, %v894_v39  ;;  %v971_v55 = vmul.f32 %v2850_v31, %v962_v21  ;;  %v873_v3 = vmul.f32 0.03125, %v865_v62 }
 0x21e   : > { %v916_v51 = vsub.f32 1.5, %v915_v63 }
 0x21f   : > { %v896_v42 = vsub.f32 1.5, %v895_v15  ;;  %v1966_v26 = vpop.eup %1965  ;;  %v881_v53 = vadd.f32 1e-06, %v873_v3 }
 0x220   : > { %v1968_v27 = vpop.eup %1967  ;;  %v917_v47 = vmul.f32 %v2830_v30, %v916_v51  ;;  %v923_v28 = vmul.f32 %v1966_v26, %v2837_v61  ;;  %vm929_vm1 = vweird.f32 %v1966_v26 }
 0x221   : > { %v897_v25 = vmul.f32 %v1964_v37, %v896_v42  ;;  %v933_v2 = vmul.f32 %v1968_v27, %v2840_v0  ;;  %1969 = vrsqrt.f32 %v881_v53  ;;  %vm939_vm2 = vweird.f32 %v1968_v27  ;;  %vm930_vm4 = vmor %vm928_vm3, %vm929_vm1 }
 0x222   : > { %v924_v57 = vmul.f32 %v1966_v26, %v923_v28  ;;  %v921_v5 = vsel %vm920_vm14, %v2830_v30, %v917_v47  ;;  %1971 = vrsqrt.f32 %v880_v12  ;;  %v973_v30 = vmul.f32 %v2850_v31, %v964_v6  ;;  %vm940_vm6 = vmor %vm938_vm5, %vm939_vm2  ;;  %v1894_v6 = vld [vmem:[%s2137_s9 + $0x80] sm:$0xff] }
 0x223   : > { %v901_v36 = vsel %vm900_vm10, %v1964_v37, %v897_v25  ;;  %v934_v1 = vmul.f32 %v1968_v27, %v933_v2  ;;  %v965_v34 = vmul.f32 %v921_v5, %v2793_v16  ;;  %vm958_vm9 = vweird.f32 %v881_v53  ;;  %v1898_v2 = vld [vmem:[%s2137_s9 + $0xa0] sm:$0xff]  ;;  %v1895_v5 = vld [vmem:[%s2137_s9 + $0x88] sm:$0xff] }
 0x224   : > { %v963_v38 = vmul.f32 %v901_v36, %v2795_v60  ;;  %v980_v60 = vadd.f32 %v2856_v19, %v971_v55  ;;  %v925_v37 = vmul.f32 0.5, %v924_v57  ;;  %v982_v16 = vadd.f32 %v2856_v19, %v973_v30 }
 0x225   : > { %v935_v59 = vmul.f32 0.5, %v934_v1  ;;  %v974_v54 = vmul.f32 %v2850_v31, %v965_v34 }
 0x226   : > { %v972_v33 = vmul.f32 %v2850_v31, %v963_v38  ;;  %v926_v24 = vsub.f32 1.5, %v925_v37 }
 0x227   : > { %v1970_v9 = vpop.eup %1969  ;;  %v936_v20 = vsub.f32 1.5, %v935_v59  ;;  %v983_v8 = vadd.f32 %v2856_v19, %v974_v54 }
 0x228   : > { %v981_v48 = vadd.f32 %v2856_v19, %v972_v33  ;;  %v1972_v7 = vpop.eup %1971  ;;  %v927_v22 = vmul.f32 %v1966_v26, %v926_v24  ;;  %v953_v13 = vmul.f32 %v1970_v9, %v881_v53  ;;  %vm959_vm7 = vweird.f32 %v1970_v9 }
 0x229   : > { %v937_v39 = vmul.f32 %v1968_v27, %v936_v20  ;;  %v943_v41 = vmul.f32 %v1972_v7, %v880_v12  ;;  %v989_v29 = vpack.c.bf16 %v983_v8, %v982_v16  ;;  %vm949_vm8 = vweird.f32 %v1972_v7  ;;  %vm960_vm10 = vmor %vm958_vm9, %vm959_vm7 }
 0x22a   : > { %v988_v11 = vpack.c.bf16 %v981_v48, %v980_v60  ;;  %v954_v15 = vmul.f32 %v1970_v9, %v953_v13  ;;  %v931_v44 = vsel %vm930_vm4, %v1966_v26, %v927_v22  ;;  %vm950_vm12 = vmor %vm948_vm11, %vm949_vm8  ;;  %v1901_v48 = vld [vmem:[%s2137_s9 + $0xb8] sm:$0xff] }
 0x22b   : > { %v941_v63 = vsel %vm940_vm6, %v1968_v27, %v937_v39  ;;  %v944_v42 = vmul.f32 %v1972_v7, %v943_v41  ;;  %v966_v21 = vmul.f32 %v931_v44, %v2802_v43  ;;  %1229 = vmatpush.bf16.msra.mxu2 %v1901_v48 }
 0x22c   : > { %1066 = vmatmul.bf16.vlgmr.msra.gmra.mxu1 %v988_v11  ;;  %v955_v58 = vmul.f32 0.5, %v954_v15  ;;  %v967_v25 = vmul.f32 %v941_v63, %v2784_v46  ;;  %v1896_v11 = vld [vmem:[%s2137_s9 + $0x90] sm:$0xff] }
 0x22d   : > { %v945_v51 = vmul.f32 0.5, %v944_v42  ;;  %v975_v62 = vmul.f32 %v2850_v31, %v966_v21 }
 0x22e   : > { %v956_v36 = vsub.f32 1.5, %v955_v58  ;;  %v976_v61 = vmul.f32 %v2850_v31, %v967_v25 }
 0x22f   : > { %v946_v38 = vsub.f32 1.5, %v945_v51  ;;  %v984_v0 = vadd.f32 %v2856_v19, %v975_v62  ;;  %1230 = vmatpush.bf16.msra.mxu2 %v1900_v49 }
 0x230   : > { %v957_v55 = vmul.f32 %v1970_v9, %v956_v36  ;;  %v985_v26 = vadd.f32 %v2856_v19, %v976_v61 }
 0x231   : > { %v947_v32 = vmul.f32 %v1972_v7, %v946_v38 }
 0x232   : > { %v990_v43 = vpack.c.bf16 %v985_v26, %v984_v0  ;;  %v961_v46 = vsel %vm960_vm10, %v1970_v9, %v957_v55 }
 0x233   : > { %v951_v50 = vsel %vm950_vm12, %v1972_v7, %v947_v32  ;;  %v969_v27 = vmul.f32 %v961_v46, %v2811_v35  ;;  %v1899_v35 = vld [vmem:[%s2137_s9 + $0xa8] sm:$0xff] }
 0x234   : > { %v968_v3 = vmul.f32 %v951_v50, %v2804_v14  ;;  %1231 = vmatpush.bf16.msra.mxu2 %v1899_v35  ;;  %v1897_v14 = vld [vmem:[%s2137_s9 + $0x98] sm:$0xff] }
 0x235   : > { %v978_v33 = vmul.f32 %v2850_v31, %v969_v27 }
 0x236   : > { %v977_v47 = vmul.f32 %v2850_v31, %v968_v3  ;;  %v2896_v31 = vperm.slane %v2847_v45, 4 }
 0x237   : > { %v987_v28 = vadd.f32 %v2856_v19, %v978_v33 }
 0x238   : > { %v986_v52 = vadd.f32 %v2856_v19, %v977_v47  ;;  %1232 = vmatpush.bf16.msra.mxu2 %v1898_v2 }
 0x23a   : > { %v991_v60 = vpack.c.bf16 %v987_v28, %v986_v52 }
 0x23c   : > { %1071 = vmatmul.bf16.gmra.mxu1 %v989_v29  ;;  %1233 = vmatpush.bf16.msra.mxu2 %v1897_v14 }
 0x240   : > { %1234 = vmatpush.bf16.msra.mxu2 %v1896_v11 }
 0x244   : > { %1235 = vmatpush.bf16.msra.mxu2 %v1895_v5 }
 0x248   : > { %1236 = vmatpush.bf16.msra.mxu2 %v1894_v6 }
 0x24c   : > { %1076 = vmatmul.bf16.gmra.mxu1 %v990_v43 }
 0x25c   : > { %1081 = vmatmul.bf16.gmra.mxu1 %v991_v60 }
 0x2a9   : > { %v1067_v53 = vpop.f32.mrf.mxu1 }
 0x2aa   : > { %v1068_v19 = vadd.f32 %v1067_v53, %v2896_v31 }
 0x2ac   : > { %v1087_v57 = vmul.f32 %v1068_v19, %v1068_v19 }
 0x2ae   : > { %v1095_v12 = vmul.f32 %v1087_v57, %v1068_v19 }
 0x2b0   : > { %v1103_v1 = vmul.f32 0.044715, %v1095_v12 }
 0x2b1   : > { %v1069_v40 = vpop.f32.mrf.mxu1 }
 0x2b2   : > { %v1111_v34 = vadd.f32 %v1103_v1, %v1068_v19  ;;  %v1070_v37 = vadd.f32 %v1069_v40, %v2896_v31 }
 0x2b4   : > { %v1088_v59 = vmul.f32 %v1070_v37, %v1070_v37  ;;  %v1119_v54 = vmul.f32 0.7978846, %v1111_v34 }
 0x2b6   : > { %v1096_v24 = vmul.f32 %v1088_v59, %v1070_v37  ;;  %1973 = vtanh.f32 %v1119_v54 }
 0x2b8   : > { %v1104_v9 = vmul.f32 0.044715, %v1096_v24 }
 0x2b9   : > { %v1072_v30 = vpop.f32.mrf.mxu1 }
 0x2ba   : > { %v1112_v20 = vadd.f32 %v1104_v9, %v1070_v37  ;;  %v1073_v7 = vadd.f32 %v1072_v30, %v2896_v31 }
 0x2bc   : > { %v1089_v8 = vmul.f32 %v1073_v7, %v1073_v7  ;;  %v1120_v22 = vmul.f32 0.7978846, %v1112_v20  ;;  %v1974_v13 = vpop.eup %1973 }
 0x2bd   : > { %v1135_v29 = vadd.f32 1.0, %v1974_v13 }
 0x2be   : > { %v1097_v16 = vmul.f32 %v1089_v8, %v1073_v7  ;;  %1975 = vtanh.f32 %v1120_v22 }
 0x2bf   : > { %v1143_v25 = vmul.f32 0.5, %v1135_v29 }
 0x2c0   : > { %v1105_v39 = vmul.f32 0.044715, %v1097_v16 }
 0x2c1   : > { %v1074_v41 = vpop.f32.mrf.mxu1  ;;  %v1151_v38 = vmul.f32 %v1143_v25, %v1068_v19 }
 0x2c2   : > { %v1113_v15 = vadd.f32 %v1105_v39, %v1073_v7  ;;  %v1075_v44 = vadd.f32 %v1074_v41, %v2896_v31 }
 0x2c4   : > { %v1976_v63 = vpop.eup %1975  ;;  %v1090_v42 = vmul.f32 %v1075_v44, %v1075_v44  ;;  %v1121_v21 = vmul.f32 0.7978846, %v1113_v15 }
 0x2c5   : > { %v1136_v58 = vadd.f32 1.0, %v1976_v63 }
 0x2c6   : > { %v1098_v51 = vmul.f32 %v1090_v42, %v1075_v44  ;;  %1977 = vtanh.f32 %v1121_v21 }
 0x2c7   : > { %v1144_v62 = vmul.f32 0.5, %v1136_v58 }
 0x2c8   : > { %v1106_v36 = vmul.f32 0.044715, %v1098_v51 }
 0x2c9   : > { %v1077_v61 = vpop.f32.mrf.mxu1  ;;  %v1152_v0 = vmul.f32 %v1144_v62, %v1070_v37 }
 0x2ca   : > { %v1114_v55 = vadd.f32 %v1106_v36, %v1075_v44  ;;  %v1078_v26 = vadd.f32 %v1077_v61, %v2896_v31 }
 0x2cb   : > { %v1159_v32 = vpack.c.bf16 %v1152_v0, %v1151_v38 }
 0x2cc   : > { %v1091_v43 = vmul.f32 %v1078_v26, %v1078_v26  ;;  %v1122_v46 = vmul.f32 0.7978846, %v1114_v55  ;;  %v1978_v50 = vpop.eup %1977 }
 0x2cd   : > { %1237 = vmatmul.bf16.vlgmr.msra.gmra.mxu2 %v1159_v32  ;;  %v1137_v47 = vadd.f32 1.0, %v1978_v50 }
 0x2ce   : > { %v1099_v27 = vmul.f32 %v1091_v43, %v1078_v26  ;;  %1979 = vtanh.f32 %v1122_v46 }
 0x2cf   : > { %v1145_v2 = vmul.f32 0.5, %v1137_v47 }
 0x2d0   : > { %v1107_v3 = vmul.f32 0.044715, %v1099_v27 }
 0x2d1   : > { %v1079_v33 = vpop.f32.mrf.mxu1  ;;  %v1153_v57 = vmul.f32 %v1145_v2, %v1073_v7 }
 0x2d2   : > { %v1115_v28 = vadd.f32 %v1107_v3, %v1078_v26  ;;  %v1080_v52 = vadd.f32 %v1079_v33, %v2896_v31  ;;  %v1180_v3 = vperm.slane %v2847_v45, 5 }
 0x2d4   : > { %v1980_v60 = vpop.eup %1979  ;;  %v1092_v48 = vmul.f32 %v1080_v52, %v1080_v52  ;;  %v1123_v49 = vmul.f32 0.7978846, %v1115_v28 }
 0x2d5   : > { %v1138_v35 = vadd.f32 1.0, %v1980_v60 }
 0x2d6   : > { %v1100_v14 = vmul.f32 %v1092_v48, %v1080_v52  ;;  %1981 = vtanh.f32 %v1123_v49 }
 0x2d7   : > { %v1146_v53 = vmul.f32 0.5, %v1138_v35 }
 0x2d8   : > { %v1108_v19 = vmul.f32 0.044715, %v1100_v14 }
 0x2d9   : > { %v1082_v11 = vpop.f32.mrf.mxu1  ;;  %v1154_v5 = vmul.f32 %v1146_v53, %v1075_v44 }
 0x2da   : > { %v1116_v12 = vadd.f32 %v1108_v19, %v1080_v52  ;;  %v1083_v1 = vadd.f32 %v1082_v11, %v2896_v31 }
 0x2db   : > { %v1160_v40 = vpack.c.bf16 %v1154_v5, %v1153_v57 }
 0x2dc   : > { %v1093_v34 = vmul.f32 %v1083_v1, %v1083_v1  ;;  %v1124_v37 = vmul.f32 0.7978846, %v1116_v12  ;;  %v1982_v6 = vpop.eup %1981 }
 0x2dd   : > { %1242 = vmatmul.bf16.gmra.mxu2 %v1160_v40  ;;  %v1139_v9 = vadd.f32 1.0, %v1982_v6  ;;  %v1908_v6 = vld [vmem:[%s2137_s9 + $0xf0] sm:$0xff] }
 0x2de   : > { %v1101_v59 = vmul.f32 %v1093_v34, %v1083_v1  ;;  %1983 = vtanh.f32 %v1124_v37 }
 0x2df   : > { %v1147_v16 = vmul.f32 0.5, %v1139_v9  ;;  %v1903_v9 = vld [vmem:[%s2137_s9 + $0xc8] sm:$0xff] }
 0x2e0   : > { %v1109_v54 = vmul.f32 0.044715, %v1101_v59  ;;  %v1907_v59 = vld [vmem:[%s2137_s9 + $0xe8] sm:$0xff] }
 0x2e1   : > { %v1084_v24 = vpop.f32.mrf.mxu1  ;;  %v1155_v15 = vmul.f32 %v1147_v16, %v1078_v26 }
 0x2e2   : > { %v1117_v30 = vadd.f32 %v1109_v54, %v1083_v1  ;;  %v1085_v20 = vadd.f32 %v1084_v24, %v2896_v31  ;;  %v1905_v54 = vld [vmem:[%s2137_s9 + $0xd8] sm:$0xff]  ;;  %v1904_v24 = vld [vmem:[%s2137_s9 + $0xd0] sm:$0xff] }
 0x2e4   : > { %v1984_v8 = vpop.eup %1983  ;;  %v1094_v22 = vmul.f32 %v1085_v20, %v1085_v20  ;;  %v1125_v7 = vmul.f32 0.7978846, %v1117_v30  ;;  %v1902_v30 = vld [vmem:[%s2137_s9 + $0xc0] sm:$0xff] }
 0x2e5   : > { %v1140_v13 = vadd.f32 1.0, %v1984_v8  ;;  %v1916_v8 = vld [vmem:[%s2137_s9 + $0x130] sm:$0xff] }
 0x2e6   : > { %v1102_v39 = vmul.f32 %v1094_v22, %v1085_v20  ;;  %1985 = vtanh.f32 %v1125_v7  ;;  %v1915_v22 = vld [vmem:[%s2137_s9 + $0x128] sm:$0xff]  ;;  %v1914_v7 = vld [vmem:[%s2137_s9 + $0x120] sm:$0xff] }
 0x2e7   : > { %v1148_v41 = vmul.f32 0.5, %v1140_v13  ;;  %v1913_v13 = vld [vmem:[%s2137_s9 + $0x118] sm:$0xff] }
 0x2e8   : > { %v1110_v29 = vmul.f32 0.044715, %v1102_v39 }
 0x2e9   : > { %v1156_v44 = vmul.f32 %v1148_v41, %v1080_v52 }
 0x2ea   : > { %v1118_v63 = vadd.f32 %v1110_v29, %v1085_v20  ;;  %v1912_v29 = vld [vmem:[%s2137_s9 + $0x110] sm:$0xff] }
 0x2eb   : > { %v1161_v42 = vpack.c.bf16 %v1156_v44, %v1155_v15  ;;  %v1911_v15 = vld [vmem:[%s2137_s9 + $0x108] sm:$0xff]  ;;  %v1910_v44 = vld [vmem:[%s2137_s9 + $0x100] sm:$0xff] }
 0x2ec   : > { %v1126_v21 = vmul.f32 0.7978846, %v1118_v63  ;;  %v1986_v58 = vpop.eup %1985  ;;  %v1306_v63 = vperm.slane %v2847_v45, 6 }
 0x2ed   : > { %1247 = vmatmul.bf16.gmra.mxu2 %v1161_v42  ;;  %v1141_v25 = vadd.f32 1.0, %v1986_v58  ;;  %v1368_v42 = vperm.slane %v2847_v45, 7 }
 0x2ee   : > { %1987 = vtanh.f32 %v1126_v21 }
 0x2ef   : > { %v1149_v62 = vmul.f32 0.5, %v1141_v25  ;;  %v1990_v25 = vld [vmem:[%s2156_s25 + $0x8] sm:$0xff]  ;;  %s1455_s25 = scalar_lea.sflag [#allocation3], %s249_s11 }
 0x2f1   : > { %v1157_v61 = vmul.f32 %v1149_v62, %v1083_v1  ;;  %v2998_v1 = vld [vmem:[#allocation6_spill] sm:$0xff] }
 0x2f4   : > { %v1988_v51 = vpop.eup %1987 }
 0x2f5   : > { %v1142_v31 = vadd.f32 1.0, %v1988_v51  ;;  %v1370_v51 = vperm.slane %v1990_v25, 0 }
 0x2f7   : > { %v1150_v36 = vmul.f32 0.5, %v1142_v31 }
 0x2f9   : > { %v1158_v38 = vmul.f32 %v1150_v36, %v1085_v20  ;;  %v1917_v20 = vld [vmem:[%s2137_s9 + $0x138] sm:$0xff] }
 0x2fb   : > { %v1162_v0 = vpack.c.bf16 %v1158_v38, %v1157_v61 }
 0x2fd   : > { %1252 = vmatmul.bf16.gmra.mxu2 %v1162_v0  ;;  %v1391_v0 = vperm.slane %v1990_v25, 1 }
 0x350   : > { %v1238_v55 = vpop.f32.mrf.mxu2 }
 0x351   : > { %v1239_v12 = vadd.f32 %v1238_v55, %v1180_v3 }
 0x358   : > { %v1240_v32 = vpop.f32.mrf.mxu2 }
 0x359   : > { %v1241_v11 = vadd.f32 %v1240_v32, %v1180_v3 }
 0x360   : > { %v1243_v43 = vpop.f32.mrf.mxu2 }
 0x361   : > { %v1244_v53 = vadd.f32 %v1243_v43, %v1180_v3 }
 0x368   : > { %v1245_v26 = vpop.f32.mrf.mxu2 }
 0x369   : > { %v1246_v35 = vadd.f32 %v1245_v26, %v1180_v3 }
 0x36b   : > { %v1261_v57 = vadd.f32 %v1246_v35, %v2328_v56  ;;  %v1266_v56 = vld [vmem:[%s2974_s2] sm:$0xf] }
 0x370   : > { %v1248_v46 = vpop.f32.mrf.mxu2 }
 0x371   : > { %v1249_v60 = vadd.f32 %v1248_v46, %v1180_v3 }
 0x373   : > { %v1262_v19 = vadd.f32 %v1249_v60, %v2389_v23  ;;  %v1909_v23 = vld [vmem:[%s2137_s9 + $0xf8] sm:$0xff] }
 0x378   : > { %v1250_v50 = vpop.f32.mrf.mxu2 }
 0x379   : > { %v1251_v28 = vadd.f32 %v1250_v50, %v1180_v3 }
 0x37b   : > { %v1263_v2 = vadd.f32 %v1251_v28, %v2443_v17  ;;  %v1258_v17 = vadd.f32 %v1239_v12, %v2168_v18  ;;  %v1906_v18 = vld [vmem:[%s2137_s9 + $0xe0] sm:$0xff] }
 0x37d   : > { %v1269_v5 = vpack.c.bf16 %v1263_v2, %v1262_v19 }
 0x380   : > { %v1253_v27 = vpop.f32.mrf.mxu2 }
 0x381   : > { %v1254_v33 = vadd.f32 %v1253_v27, %v1180_v3 }
 0x383   : > { %v1264_v48 = vadd.f32 %v1254_v33, %v2502_v4  ;;  %v1260_v4 = vadd.f32 %v1244_v53, %v2998_v1 }
 0x385   : > { %v1268_v34 = vpack.c.bf16 %v1261_v57, %v1260_v4 }
 0x388   : > { %v1255_v47 = vpop.f32.mrf.mxu2 }
 0x389   : > { %v1256_v52 = vadd.f32 %v1255_v47, %v1180_v3 }
 0x38b   : > { %v1265_v49 = vadd.f32 %v1256_v52, %v2568_v10  ;;  %v2999_v10 = vld [vmem:[#allocation5_spill] sm:$0xff] }
 0x38c   : > { %v1259_v40 = vadd.f32 %v1241_v11, %v2999_v10 }
 0x38d   : > { %v1270_v14 = vpack.c.bf16 %v1265_v49, %v1264_v48 }
 0x38e   : > { %v1267_v37 = vpack.c.bf16 %v1259_v40, %v1258_v17 }
 0x38f   : > { %1279 = vmatpush.bf16.msra.mxu3 %v1270_v14 }
 0x393   : > { %1280 = vmatpush.bf16.msra.mxu3 %v1269_v5 }
 0x397   : > { %1281 = vmatpush.bf16.msra.mxu3 %v1268_v34 }
 0x39b   : > { %1282 = vmatpush.bf16.msra.mxu3 %v1267_v37 }
 0x39e   : > { %1771 = vmatmul.msk.bf16.vlgmr.msra.gmra.mxu3 %vm1271_vm13, %v1266_v56 }
 0x39f   : > { %1355 = vmatpush.bf16.msrb.mxu3 %v1909_v23 }
 0x3a3   : > { %1356 = vmatpush.bf16.msrb.mxu3 %v1908_v6 }
 0x3a7   : > { %1357 = vmatpush.bf16.msrb.mxu3 %v1907_v59 }
 0x3ab   : > { %1358 = vmatpush.bf16.msrb.mxu3 %v1906_v18 }
 0x3af   : > { %1359 = vmatpush.bf16.msrb.mxu3 %v1905_v54 }
 0x3b3   : > { %1360 = vmatpush.bf16.msrb.mxu3 %v1904_v24 }
 0x3b7   : > { %1361 = vmatpush.bf16.msrb.mxu3 %v1903_v9 }
 0x3bb   : > { %1362 = vmatpush.bf16.msrb.mxu3 %v1902_v30 }
 0x3bf   : > { %1440 = vmatpush.bf16.msra.mxu3 %v1917_v20 }
 0x3c3   : > { %1441 = vmatpush.bf16.msra.mxu3 %v1916_v8 }
 0x3c7   : > { %1442 = vmatpush.bf16.msra.mxu3 %v1915_v22 }
 0x3cb   : > { %1443 = vmatpush.bf16.msra.mxu3 %v1914_v7 }
 0x3cf   : > { %1444 = vmatpush.bf16.msra.mxu3 %v1913_v13 }
 0x3d3   : > { %1445 = vmatpush.bf16.msra.mxu3 %v1912_v29 }
 0x3d7   : > { %1446 = vmatpush.bf16.msra.mxu3 %v1911_v15 }
 0x3db   : > { %1447 = vmatpush.bf16.msra.mxu3 %v1910_v44 }
 0x421   : > { %v1284_v16 = vpop.f32.mrf.mxu3 }
 0x422   : > { %v1288_v39 = vpack.c.bf16 %v1284_v16, %v1284_v16 }
 0x424   : > { %1363 = vmatmul.bf16.vlgmr.msrb.gmra.mxu3 %v1288_v39 }
 0x429   : > { %v1286_v41 = vpop.f32.mrf.mxu3 }
 0x4a7   : > { %v1364_v21 = vpop.f32.mrf.mxu3 }
 0x4a8   : > { %v1365_v58 = vadd.f32 %v1364_v21, %v1306_v63 }
 0x4aa   : > { %v1369_v31 = vmul.f32 %v1368_v42, %v1365_v58 }
 0x4ac   : > { %v1371_v62 = vadd.f32 %v1370_v51, %v1369_v31 }
 0x4ae   : > { %v1372_v36 = vmax.f32 %v1371_v62, 0.0 }
 0x4af   : > { %v1366_v61 = vpop.f32.mrf.mxu3 }
 0x4b0   : > { %v1373_v38 = vpack.c.bf16 %v1372_v36, %v1372_v36 }
 0x4b2   : > { %1448 = vmatmul.bf16.vlgmr.msra.gmra.mxu3 %v1373_v38 }
 0x535   : > { %v1449_v45 = vpop.f32.mrf.mxu3 }
 0x536   : > { %v1450_v55 = vadd.f32 %v1449_v45, %v1391_v0 }
 0x538   : > { %1453 = vst [vmem:[%s251_s16] sm:$0xff] %v1450_v55 }
 0x539   : > { %2018 = shalt.err (!%p2015_p7)
}
 0x53a   : > { %1918 = dma.vmem_to_hbm [thread:$0]  (%p2123_p5), %s1468_s17, 128, %s1470_s23, %s1455_s25  }
 0x53d   : > { %v1451_v32 = vpop.f32.mrf.mxu3 }
 0x53e PF: > { %p1924_p8 = scmp.ge.s32.totalorder %s2053_s21, 2  ;;  %s1481_s11 = sand.u32 1, %s2041_s18  }
 0x53f   : > { %s1482_s12 = scalar_lea.sflag [#allocation3], %s1481_s11 }
 0x540   : > { %p1921_p9 = pnand %p1924_p8, %p2127_p6 }
 0x542   : > { %p1922_p10 = pneg %p1921_p9 }
 0x544   : > { %2036 = dma.done.wait (%p1922_p10), %s1482_s12, 128  }
 0x545   : > { %2038 = vsyncadd (%p1922_p10), %s1482_s12, 4294967168  ;;  %p15_p11 = scmp.ge.s32.totalorder %s2110_s24, 4   ;;  %s3000_s18 = smov %s2045_s19 }
 0x546   : > { %s3001_s19 = smov %s2049_s20  ;;  %s3002_s20 = smov %s2121_s27 }
 0x547   : > { %s3003_s21 = smov %s2110_s24  ;;  %17 = sbr.rel (!%p15_p11) target bundleno = 3 (0x3), region = 93 }
 0x54c   :  { %1488 = vsyncpa [#allocation3], 1 }
 0x54d   :  { %1490 = vsyncpa [#allocation3 + $0x1], 1 }

</bundles_post_ra>
